<compile_context>
chip_gen: v6e
topology: v6e:2x2x1
jax: 0.10.0
libtpu: 0.0.40
codegen_flags: <defaults>
</compile_context>

<pallas_src>
import numpy as np
import jax
import jax.numpy as jnp
from jax import lax
from jax.experimental import pallas as pl
from jax.experimental.pallas import tpu as pltpu

# ---- module hyper-parameters (small, consistent with __init__) --------------
HIDDEN = 32          # hidden_size
NUM_LAYERS = 2       # num_lstm_layers
OP_SIZE = 8          # op_size
GAP = 4              # dyn_gap_count
ACTION_LEN = 3       # action_len
FILL = 1             # fill

B_TILE = 8           # batch rows per grid step (fills the 8 f32 sublanes)


# -------------------------- kernel helpers -----------------------------------
def _lstm_step(x, h, c, w_ref, b_ref):
    """One fused multi-layer LSTM step for a (B_TILE, H) batch.

    w_ref: (L, 2H, 4H) bf16, columns in PyTorch gate order (i, f, g, o).
    Each layer is a single (B, 2H) @ (2H, 4H) MXU matmul; sigmoid / tanh are
    each applied once over the full (B, 4H) gates tile.
    """
    new_h, new_c = [], []
    inp = x
    for l in range(NUM_LAYERS):
        xh = jnp.concatenate([inp, h[l]], axis=-1).astype(jnp.bfloat16)   # (B, 2H)
        gates = (jnp.dot(xh, w_ref[l], preferred_element_type=jnp.float32)
                 + b_ref[l])                                              # (B, 4H) f32
        sig = jax.nn.sigmoid(gates)       # one EUP pass
        tah = jnp.tanh(gates)             # one EUP pass
        i_g = sig[:, 0 * HIDDEN:1 * HIDDEN]
        f_g = sig[:, 1 * HIDDEN:2 * HIDDEN]
        g_g = tah[:, 2 * HIDDEN:3 * HIDDEN]
        o_g = sig[:, 3 * HIDDEN:4 * HIDDEN]
        c_new = f_g * c[l] + i_g * g_g
        h_new = o_g * jnp.tanh(c_new)
        new_h.append(h_new)
        new_c.append(c_new)
        inp = h_new
    return inp, new_h, new_c


def _critic(logits, idx_col, col_iota):
    """Row-wise entropy of softmax(logits) and log_softmax(logits)[b, idx[b]]."""
    m = jnp.max(logits, axis=-1, keepdims=True)
    z = logits - m
    p = jnp.exp(z)                                   # single exp
    s = jnp.sum(p, axis=-1, keepdims=True)
    logp = z - jnp.log(s)
    probs = p * pl.reciprocal(s, approx=True)
    ent = -jnp.sum(probs * logp, axis=-1, keepdims=True)                  # (B, 1)
    lp = jnp.sum(jnp.where(col_iota == idx_col, logp, jnp.float32(0.0)),
                 axis=-1, keepdims=True)                                  # (B, 1)
    return ent, lp


# ------------------------------ kernel ----------------------------------------
def micro_controller_kernel(ctx_cfg_ref, left_cfg_ref,
                            g_emb_ref, w_ref, b_ref,
                            ctxw_ref, ctxb_ref, leftw_ref, leftb_ref,
                            ent_ref, lp_ref):
    x = jnp.broadcast_to(g_emb_ref[...], (B_TILE, HIDDEN))
    h = [jnp.zeros((B_TILE, HIDDEN), jnp.float32) for _ in range(NUM_LAYERS)]
    c = [jnp.zeros((B_TILE, HIDDEN), jnp.float32) for _ in range(NUM_LAYERS)]
    ent = jnp.zeros((B_TILE, 1), jnp.float32)
    lp = jnp.zeros((B_TILE, 1), jnp.float32)

    # hoisted iota constants (JAX does not CSE broadcast_in_dim)
    col_op = lax.broadcasted_iota(jnp.int32, (B_TILE, OP_SIZE), 1)
    col_gap = lax.broadcasted_iota(jnp.int32, (B_TILE, GAP), 1)

    for i in range(ACTION_LEN):
        # --- LSTM step + ctx classifier -------------------------------------
        out, h, c = _lstm_step(x, h, c, w_ref, b_ref)
        logits = (jnp.dot(out.astype(jnp.bfloat16), ctxw_ref[i],
                          preferred_element_type=jnp.float32) + ctxb_ref[i])
        idx = ctx_cfg_ref[:, i:i + 1]                 # (B, 1) int32
        e1, l1 = _critic(logits, idx, col_op)
        ent += e1
        lp += l1
        x = out

        if FILL:
            # rows in the batch diverge, so compute the branch for all rows and
            # select per-row with where (matches the config[i]==1 semantics).
            out2, h2, c2 = _lstm_step(x, h, c, w_ref, b_ref)
            logits2 = (jnp.dot(out2.astype(jnp.bfloat16), leftw_ref[i],
                               preferred_element_type=jnp.float32) + leftb_ref[i])
            lidx = left_cfg_ref[:, i:i + 1]
            e2, l2 = _critic(logits2, lidx, col_gap)
            take = (idx == 1)                          # (B, 1) bool
            takef = take.astype(jnp.float32)
            ent += takef * e2
            lp += takef * l2
            x = jnp.where(take, out2, x)
            h = [jnp.where(take, h2[l], h[l]) for l in range(NUM_LAYERS)]
            c = [jnp.where(take, c2[l], c[l]) for l in range(NUM_LAYERS)]

    ent_ref[...] = ent
    lp_ref[...] = lp


# ------------------------------ wrapper ---------------------------------------
def micro_controller_evaluate_batch(ctx_config, left_config, kparams):
    """Evaluate entropy / log_prob of a batch of (config, left_config) pairs."""
    (g_emb, w_fused, bias, ctx_w, ctx_b, left_w, left_b) = kparams
    B = ctx_config.shape[0]
    assert B % B_TILE == 0
    num_blocks = B // B_TILE

    const3 = lambda g: (0, 0, 0)
    const2 = lambda g: (0, 0)
    batch2 = lambda g: (g, 0)

    ent, lp = pl.pallas_call(
        micro_controller_kernel,
        out_shape=(jax.ShapeDtypeStruct((B, 1), jnp.float32),
                   jax.ShapeDtypeStruct((B, 1), jnp.float32)),
        grid=(num_blocks,),
        in_specs=[
            pl.BlockSpec((B_TILE, ACTION_LEN), batch2),                    # ctx cfg
            pl.BlockSpec((B_TILE, ACTION_LEN), batch2),                    # left cfg
            pl.BlockSpec((1, HIDDEN), const2),                             # g_emb
            pl.BlockSpec((NUM_LAYERS, 2 * HIDDEN, 4 * HIDDEN), const3),    # fused W
            pl.BlockSpec((NUM_LAYERS, 1, 4 * HIDDEN), const3),             # bias
            pl.BlockSpec((ACTION_LEN, HIDDEN, OP_SIZE), const3),           # ctx W
            pl.BlockSpec((ACTION_LEN, 1, OP_SIZE), const3),                # ctx b
            pl.BlockSpec((ACTION_LEN, HIDDEN, GAP), const3),               # left W
            pl.BlockSpec((ACTION_LEN, 1, GAP), const3),                    # left b
        ],
        out_specs=(pl.BlockSpec((B_TILE, 1), batch2),
                   pl.BlockSpec((B_TILE, 1), batch2)),
        compiler_params=pltpu.CompilerParams(
            dimension_semantics=("parallel",)),
    )(ctx_config, left_config, g_emb, w_fused, bias,
      ctx_w, ctx_b, left_w, left_b)
    return ent[:, 0], lp[:, 0]


# --------------------- deterministic parameter init ---------------------------
def init_params(key):
    """f32 'PyTorch-like' parameters (uniform(-0.1, 0.1), as reset_parameters)."""
    def uni(k, shape):
        return jax.random.uniform(k, shape, jnp.float32, -0.1, 0.1)

    n_keys = 1 + 4 * NUM_LAYERS + 4 * ACTION_LEN
    ks = iter(jax.random.split(key, n_keys))

    g_emb = uni(next(ks), (1, HIDDEN))                                       # (1, H)
    wih = jnp.stack([uni(next(ks), (4 * HIDDEN, HIDDEN)) for _ in range(NUM_LAYERS)])
    whh = jnp.stack([uni(next(ks), (4 * HIDDEN, HIDDEN)) for _ in range(NUM_LAYERS)])
    bih = jnp.stack([uni(next(ks), (4 * HIDDEN,)) for _ in range(NUM_LAYERS)])
    bhh = jnp.stack([uni(next(ks), (4 * HIDDEN,)) for _ in range(NUM_LAYERS)])
    ctx_w = jnp.stack([uni(next(ks), (OP_SIZE, HIDDEN)) for _ in range(ACTION_LEN)])
    ctx_b = jnp.stack([uni(next(ks), (OP_SIZE,)) for _ in range(ACTION_LEN)])
    left_w = jnp.stack([uni(next(ks), (GAP, HIDDEN)) for _ in range(ACTION_LEN)])
    left_b = jnp.stack([uni(next(ks), (GAP,)) for _ in range(ACTION_LEN)])
    # right_fcs exist in __init__ but are unused in forward -> omitted.
    return dict(g_emb=g_emb, wih=wih, whh=whh, bih=bih, bhh=bhh,
                ctx_w=ctx_w, ctx_b=ctx_b, left_w=left_w, left_b=left_b)


def pack_kernel_params(p):
    """Glue: fuse/transpose/cast parameters for the kernel layout."""
    w_fused = jnp.concatenate(
        [jnp.transpose(p["wih"], (0, 2, 1)),      # (L, H, 4H)
         jnp.transpose(p["whh"], (0, 2, 1))],     # (L, H, 4H)
        axis=1).astype(jnp.bfloat16)              # (L, 2H, 4H) bf16
    bias = (p["bih"] + p["bhh"])[:, None, :]                              # (L, 1, 4H) f32
    ctx_w = jnp.transpose(p["ctx_w"], (0, 2, 1)).astype(jnp.bfloat16)     # (A, H, OP)
    ctx_b = p["ctx_b"][:, None, :]                                        # (A, 1, OP)
    left_w = jnp.transpose(p["left_w"], (0, 2, 1)).astype(jnp.bfloat16)   # (A, H, GAP)
    left_b = p["left_b"][:, None, :]                                      # (A, 1, GAP)
    return (p["g_emb"], w_fused, bias, ctx_w, ctx_b, left_w, left_b)


# --------------------------- plain-JAX reference -------------------------------
def reference_evaluate_one(ctx_cfg, left_cfg, p):
    """Faithful f32 reference of forward(config, l_config) for one config."""
    wih_t = jnp.transpose(p["wih"], (0, 2, 1))
    whh_t = jnp.transpose(p["whh"], (0, 2, 1))
    bias = p["bih"] + p["bhh"]
    ctx_w_t = jnp.transpose(p["ctx_w"], (0, 2, 1))
    left_w_t = jnp.transpose(p["left_w"], (0, 2, 1))

    def lstm_step(x, h, c):
        nh, nc = [], []
        inp = x
        for l in range(NUM_LAYERS):
            gates = inp @ wih_t[l] + h[l] @ whh_t[l] + bias[l][None, :]
            i_g = jax.nn.sigmoid(gates[:, 0 * HIDDEN:1 * HIDDEN])
            f_g = jax.nn.sigmoid(gates[:, 1 * HIDDEN:2 * HIDDEN])
            g_g = jnp.tanh(gates[:, 2 * HIDDEN:3 * HIDDEN])
            o_g = jax.nn.sigmoid(gates[:, 3 * HIDDEN:4 * HIDDEN])
            c_new = f_g * c[l] + i_g * g_g
            h_new = o_g * jnp.tanh(c_new)
            nh.append(h_new)
            nc.append(c_new)
            inp = h_new
        return inp, nh, nc

    def critic(logits, idx):
        logp = jax.nn.log_softmax(logits, axis=-1)
        prob = jnp.exp(logp)
        return -jnp.sum(prob * logp), logp[0, idx]

    x = p["g_emb"]
    h = [jnp.zeros((1, HIDDEN), jnp.float32) for _ in range(NUM_LAYERS)]
    c = [jnp.zeros((1, HIDDEN), jnp.float32) for _ in range(NUM_LAYERS)]
    ent = 0.0
    lp = 0.0
    for i in range(ACTION_LEN):
        out, h, c = lstm_step(x, h, c)
        e1, l1 = critic(out @ ctx_w_t[i] + p["ctx_b"][i][None, :], int(ctx_cfg[i]))
        ent += e1
        lp += l1
        x = out
        if FILL and int(ctx_cfg[i]) == 1:
            out, h, c = lstm_step(x, h, c)
            e2, l2 = critic(out @ left_w_t[i] + p["left_b"][i][None, :],
                            int(left_cfg[i]))
            ent += e2
            lp += l2
            x = out
    return jnp.float32(ent), jnp.float32(lp)


# ------------------------------------ main -------------------------------------
if __name__ == "__main__":
    params = init_params(jax.random.PRNGKey(0))
    kparams = pack_kernel_params(params)

    # batch of architectures to evaluate (ctx op indices and left gap indices)
    B = 2 * B_TILE   # 16 configs; 2 grid steps of 8 (parallel -> 2 TCs on v7x)
    kc, kl = jax.random.split(jax.random.PRNGKey(1))
    ctx_config = jax.random.randint(kc, (B, ACTION_LEN), 0, OP_SIZE, dtype=jnp.int32)
    left_config = jax.random.randint(kl, (B, ACTION_LEN), 0, GAP, dtype=jnp.int32)
    # guarantee both FILL branches (taken / not taken) are exercised
    ctx_config = ctx_config.at[0].set(jnp.array([1, 0, 1], jnp.int32))
    ctx_config = ctx_config.at[1].set(jnp.array([0, 2, 3], jnp.int32))

    ent, lp = micro_controller_evaluate_batch(ctx_config, left_config, kparams)
    jax.block_until_ready((ent, lp))

    cc = np.asarray(ctx_config)
    lc = np.asarray(left_config)
    ents_ref, lps_ref = [], []
    for b in range(B):
        e_r, l_r = reference_evaluate_one(cc[b], lc[b], params)
        ents_ref.append(e_r)
        lps_ref.append(l_r)
    ent_ref = jnp.stack(ents_ref)
    lp_ref = jnp.stack(lps_ref)

    # tolerance slightly relaxed vs f32-only version because the kernel uses
    # bf16 MXU operands (f32 accumulation / state math).
    assert jnp.allclose(ent, ent_ref, rtol=5e-3, atol=5e-3), (ent, ent_ref)
    assert jnp.allclose(lp, lp_ref, rtol=5e-3, atol=5e-3), (lp, lp_ref)

    print("KERNEL_OK")
</pallas_src>

<mosaic_0001>
module attributes {stable_mosaic.version = 11 : i64} {
  func.func @micro_controller_kernel(%arg0: i32, %arg1: memref<8x3xi32, #tpu.memory_space<vmem>>, %arg2: memref<8x3xi32, #tpu.memory_space<vmem>>, %arg3: memref<1x32xf32, #tpu.memory_space<vmem>>, %arg4: memref<2x64x128xbf16, #tpu.memory_space<vmem>>, %arg5: memref<2x1x128xf32, #tpu.memory_space<vmem>>, %arg6: memref<3x32x8xbf16, #tpu.memory_space<vmem>>, %arg7: memref<3x1x8xf32, #tpu.memory_space<vmem>>, %arg8: memref<3x32x4xbf16, #tpu.memory_space<vmem>>, %arg9: memref<3x1x4xf32, #tpu.memory_space<vmem>>, %arg10: memref<8x1xf32, #tpu.memory_space<vmem>>, %arg11: memref<8x1xf32, #tpu.memory_space<vmem>>) attributes {dimension_semantics = [#tpu.dimension_semantics<parallel>], iteration_bounds = array<i64: 2>, scalar_prefetch = 0 : i64, scratch_operands = 0 : i64, tpu.core_type = #tpu.core_type<tc>, window_params = [{transform_indices = @transform_0, window_bounds = array<i64: 8, 3>}, {transform_indices = @transform_1, window_bounds = array<i64: 8, 3>}, {pipeline_mode = #tpu.pipeline_mode<synchronous>, transform_indices = @transform_2, window_bounds = array<i64: 1, 32>}, {pipeline_mode = #tpu.pipeline_mode<synchronous>, transform_indices = @transform_3, window_bounds = array<i64: 2, 64, 128>}, {pipeline_mode = #tpu.pipeline_mode<synchronous>, transform_indices = @transform_4, window_bounds = array<i64: 2, 1, 128>}, {pipeline_mode = #tpu.pipeline_mode<synchronous>, transform_indices = @transform_5, window_bounds = array<i64: 3, 32, 8>}, {pipeline_mode = #tpu.pipeline_mode<synchronous>, transform_indices = @transform_6, window_bounds = array<i64: 3, 1, 8>}, {pipeline_mode = #tpu.pipeline_mode<synchronous>, transform_indices = @transform_7, window_bounds = array<i64: 3, 32, 4>}, {pipeline_mode = #tpu.pipeline_mode<synchronous>, transform_indices = @transform_8, window_bounds = array<i64: 3, 1, 4>}, {transform_indices = @transform_9, window_bounds = array<i64: 8, 1>}, {transform_indices = @transform_10, window_bounds = array<i64: 8, 1>}]} {
    %c0 = arith.constant 0 : index
    %c0_0 = arith.constant 0 : index
    %0 = vector.load %arg3[%c0, %c0_0] : memref<1x32xf32, #tpu.memory_space<vmem>>, vector<1x32xf32>
    %1 = vector.shape_cast %0 : vector<1x32xf32> to vector<1x32xf32>
    %2 = vector.broadcast %1 : vector<1x32xf32> to vector<8x32xf32>
    %cst = arith.constant 0.000000e+00 : f32
    %3 = vector.broadcast %cst : f32 to vector<8x32xf32>
    %cst_1 = arith.constant 0.000000e+00 : f32
    %4 = vector.broadcast %cst_1 : f32 to vector<8x32xf32>
    %cst_2 = arith.constant 0.000000e+00 : f32
    %5 = vector.broadcast %cst_2 : f32 to vector<8x32xf32>
    %cst_3 = arith.constant 0.000000e+00 : f32
    %6 = vector.broadcast %cst_3 : f32 to vector<8x32xf32>
    %cst_4 = arith.constant 0.000000e+00 : f32
    %7 = vector.broadcast %cst_4 : f32 to vector<8x1xf32>
    %cst_5 = arith.constant 0.000000e+00 : f32
    %8 = vector.broadcast %cst_5 : f32 to vector<8x1xf32>
    %9 = tpu.iota {dimensions = array<i32: 1>} : vector<8x8xi32>
    %10 = tpu.iota {dimensions = array<i32: 1>} : vector<8x4xi32>
    %11 = tpu.concatenate %2, %3 in 1 : vector<8x32xf32>, vector<8x32xf32> -> vector<8x64xf32>
    %12 = arith.truncf %11 : vector<8x64xf32> to vector<8x64xbf16>
    %c0_6 = arith.constant 0 : index
    %c0_7 = arith.constant 0 : index
    %c0_8 = arith.constant 0 : index
    %13 = vector.load %arg4[%c0_6, %c0_7, %c0_8] : memref<2x64x128xbf16, #tpu.memory_space<vmem>>, vector<1x64x128xbf16>
    %14 = vector.shape_cast %13 : vector<1x64x128xbf16> to vector<64x128xbf16>
    %cst_9 = arith.constant dense<0.000000e+00> : vector<8x128xf32>
    %15 = tpu.matmul %12, %14, %cst_9 {dimension_numbers = #tpu.dot_dimension_numbers<[1], [0], [0], [1], [0, 0, 1, 1], [], []>} : vector<8x64xbf16>, vector<64x128xbf16>, vector<8x128xf32> -> vector<8x128xf32>
    %c0_10 = arith.constant 0 : index
    %c0_11 = arith.constant 0 : index
    %c0_12 = arith.constant 0 : index
    %16 = vector.load %arg5[%c0_10, %c0_11, %c0_12] : memref<2x1x128xf32, #tpu.memory_space<vmem>>, vector<1x1x128xf32>
    %17 = vector.shape_cast %16 : vector<1x1x128xf32> to vector<1x128xf32>
    %18 = vector.broadcast %17 : vector<1x128xf32> to vector<8x128xf32>
    %19 = arith.addf %15, %18 : vector<8x128xf32>
    %20 = arith.negf %19 : vector<8x128xf32>
    %21 = math.exp %20 : vector<8x128xf32>
    %cst_13 = arith.constant 1.000000e+00 : f32
    %22 = vector.broadcast %cst_13 : f32 to vector<8x128xf32>
    %23 = arith.addf %22, %21 : vector<8x128xf32>
    %24 = arith.divf %22, %23 : vector<8x128xf32>
    %25 = math.tanh %19 : vector<8x128xf32>
    %26 = vector.extract_strided_slice %24 {offsets = [0, 0], sizes = [8, 32], strides = [1, 1]} : vector<8x128xf32> to vector<8x32xf32>
    %27 = vector.extract_strided_slice %24 {offsets = [0, 32], sizes = [8, 32], strides = [1, 1]} : vector<8x128xf32> to vector<8x32xf32>
    %28 = vector.extract_strided_slice %25 {offsets = [0, 64], sizes = [8, 32], strides = [1, 1]} : vector<8x128xf32> to vector<8x32xf32>
    %29 = vector.extract_strided_slice %24 {offsets = [0, 96], sizes = [8, 32], strides = [1, 1]} : vector<8x128xf32> to vector<8x32xf32>
    %30 = arith.mulf %27, %5 : vector<8x32xf32>
    %31 = arith.mulf %26, %28 : vector<8x32xf32>
    %32 = arith.addf %30, %31 : vector<8x32xf32>
    %33 = math.tanh %32 : vector<8x32xf32>
    %34 = arith.mulf %29, %33 : vector<8x32xf32>
    %35 = tpu.concatenate %34, %4 in 1 : vector<8x32xf32>, vector<8x32xf32> -> vector<8x64xf32>
    %36 = arith.truncf %35 : vector<8x64xf32> to vector<8x64xbf16>
    %c1 = arith.constant 1 : index
    %c0_14 = arith.constant 0 : index
    %c0_15 = arith.constant 0 : index
    %37 = vector.load %arg4[%c1, %c0_14, %c0_15] : memref<2x64x128xbf16, #tpu.memory_space<vmem>>, vector<1x64x128xbf16>
    %38 = vector.shape_cast %37 : vector<1x64x128xbf16> to vector<64x128xbf16>
    %cst_16 = arith.constant dense<0.000000e+00> : vector<8x128xf32>
    %39 = tpu.matmul %36, %38, %cst_16 {dimension_numbers = #tpu.dot_dimension_numbers<[1], [0], [0], [1], [0, 0, 1, 1], [], []>} : vector<8x64xbf16>, vector<64x128xbf16>, vector<8x128xf32> -> vector<8x128xf32>
    %c1_17 = arith.constant 1 : index
    %c0_18 = arith.constant 0 : index
    %c0_19 = arith.constant 0 : index
    %40 = vector.load %arg5[%c1_17, %c0_18, %c0_19] : memref<2x1x128xf32, #tpu.memory_space<vmem>>, vector<1x1x128xf32>
    %41 = vector.shape_cast %40 : vector<1x1x128xf32> to vector<1x128xf32>
    %42 = vector.broadcast %41 : vector<1x128xf32> to vector<8x128xf32>
    %43 = arith.addf %39, %42 : vector<8x128xf32>
    %44 = arith.negf %43 : vector<8x128xf32>
    %45 = math.exp %44 : vector<8x128xf32>
    %cst_20 = arith.constant 1.000000e+00 : f32
    %46 = vector.broadcast %cst_20 : f32 to vector<8x128xf32>
    %47 = arith.addf %46, %45 : vector<8x128xf32>
    %48 = arith.divf %46, %47 : vector<8x128xf32>
    %49 = math.tanh %43 : vector<8x128xf32>
    %50 = vector.extract_strided_slice %48 {offsets = [0, 0], sizes = [8, 32], strides = [1, 1]} : vector<8x128xf32> to vector<8x32xf32>
    %51 = vector.extract_strided_slice %48 {offsets = [0, 32], sizes = [8, 32], strides = [1, 1]} : vector<8x128xf32> to vector<8x32xf32>
    %52 = vector.extract_strided_slice %49 {offsets = [0, 64], sizes = [8, 32], strides = [1, 1]} : vector<8x128xf32> to vector<8x32xf32>
    %53 = vector.extract_strided_slice %48 {offsets = [0, 96], sizes = [8, 32], strides = [1, 1]} : vector<8x128xf32> to vector<8x32xf32>
    %54 = arith.mulf %51, %6 : vector<8x32xf32>
    %55 = arith.mulf %50, %52 : vector<8x32xf32>
    %56 = arith.addf %54, %55 : vector<8x32xf32>
    %57 = math.tanh %56 : vector<8x32xf32>
    %58 = arith.mulf %53, %57 : vector<8x32xf32>
    %59 = arith.truncf %58 : vector<8x32xf32> to vector<8x32xbf16>
    %c0_21 = arith.constant 0 : index
    %c0_22 = arith.constant 0 : index
    %c0_23 = arith.constant 0 : index
    %60 = vector.load %arg6[%c0_21, %c0_22, %c0_23] : memref<3x32x8xbf16, #tpu.memory_space<vmem>>, vector<1x32x8xbf16>
    %61 = vector.shape_cast %60 : vector<1x32x8xbf16> to vector<32x8xbf16>
    %cst_24 = arith.constant dense<0.000000e+00> : vector<8x8xf32>
    %62 = tpu.matmul %59, %61, %cst_24 {dimension_numbers = #tpu.dot_dimension_numbers<[1], [0], [0], [1], [0, 0, 1, 1], [], []>} : vector<8x32xbf16>, vector<32x8xbf16>, vector<8x8xf32> -> vector<8x8xf32>
    %c0_25 = arith.constant 0 : index
    %c0_26 = arith.constant 0 : index
    %c0_27 = arith.constant 0 : index
    %63 = vector.load %arg7[%c0_25, %c0_26, %c0_27] : memref<3x1x8xf32, #tpu.memory_space<vmem>>, vector<1x1x8xf32>
    %64 = vector.shape_cast %63 : vector<1x1x8xf32> to vector<1x8xf32>
    %65 = vector.broadcast %64 : vector<1x8xf32> to vector<8x8xf32>
    %66 = arith.addf %62, %65 : vector<8x8xf32>
    %c0_28 = arith.constant 0 : index
    %c0_29 = arith.constant 0 : index
    %67 = vector.load %arg1[%c0_28, %c0_29] : memref<8x3xi32, #tpu.memory_space<vmem>>, vector<8x1xi32>
    %cst_30 = arith.constant dense<0xFF800000> : vector<8xf32>
    %68 = vector.multi_reduction <maximumf>, %66, %cst_30 [1] : vector<8x8xf32> to vector<8xf32>
    %69 = vector.shape_cast %68 : vector<8xf32> to vector<8x1xf32>
    %70 = vector.broadcast %69 : vector<8x1xf32> to vector<8x8xf32>
    %71 = arith.subf %66, %70 : vector<8x8xf32>
    %72 = math.exp %71 : vector<8x8xf32>
    %cst_31 = arith.constant dense<0.000000e+00> : vector<8xf32>
    %73 = vector.multi_reduction <add>, %72, %cst_31 [1] : vector<8x8xf32> to vector<8xf32>
    %74 = vector.shape_cast %73 : vector<8xf32> to vector<8x1xf32>
    %75 = math.log %74 : vector<8x1xf32>
    %76 = vector.broadcast %75 : vector<8x1xf32> to vector<8x8xf32>
    %77 = arith.subf %71, %76 : vector<8x8xf32>
    %78 = tpu.reciprocal %74 {approx = true} : vector<8x1xf32> -> vector<8x1xf32>
    %79 = vector.broadcast %78 : vector<8x1xf32> to vector<8x8xf32>
    %80 = arith.mulf %72, %79 : vector<8x8xf32>
    %81 = arith.mulf %80, %77 : vector<8x8xf32>
    %cst_32 = arith.constant dense<0.000000e+00> : vector<8xf32>
    %82 = vector.multi_reduction <add>, %81, %cst_32 [1] : vector<8x8xf32> to vector<8xf32>
    %83 = vector.shape_cast %82 : vector<8xf32> to vector<8x1xf32>
    %cst_33 = arith.constant 0.000000e+00 : f32
    %84 = vector.broadcast %cst_33 : f32 to vector<8x1xf32>
    %85 = arith.subf %84, %83 : vector<8x1xf32>
    %86 = vector.broadcast %67 : vector<8x1xi32> to vector<8x8xi32>
    %87 = arith.cmpi eq, %9, %86 : vector<8x8xi32>
    %cst_34 = arith.constant 0.000000e+00 : f32
    %88 = vector.broadcast %cst_34 : f32 to vector<8x8xf32>
    %89 = arith.select %87, %77, %88 : vector<8x8xi1>, vector<8x8xf32>
    %cst_35 = arith.constant dense<0.000000e+00> : vector<8xf32>
    %90 = vector.multi_reduction <add>, %89, %cst_35 [1] : vector<8x8xf32> to vector<8xf32>
    %91 = vector.shape_cast %90 : vector<8xf32> to vector<8x1xf32>
    %92 = arith.addf %7, %85 : vector<8x1xf32>
    %93 = arith.addf %8, %91 : vector<8x1xf32>
    %94 = tpu.concatenate %58, %34 in 1 : vector<8x32xf32>, vector<8x32xf32> -> vector<8x64xf32>
    %95 = arith.truncf %94 : vector<8x64xf32> to vector<8x64xbf16>
    %c0_36 = arith.constant 0 : index
    %c0_37 = arith.constant 0 : index
    %c0_38 = arith.constant 0 : index
    %96 = vector.load %arg4[%c0_36, %c0_37, %c0_38] : memref<2x64x128xbf16, #tpu.memory_space<vmem>>, vector<1x64x128xbf16>
    %97 = vector.shape_cast %96 : vector<1x64x128xbf16> to vector<64x128xbf16>
    %cst_39 = arith.constant dense<0.000000e+00> : vector<8x128xf32>
    %98 = tpu.matmul %95, %97, %cst_39 {dimension_numbers = #tpu.dot_dimension_numbers<[1], [0], [0], [1], [0, 0, 1, 1], [], []>} : vector<8x64xbf16>, vector<64x128xbf16>, vector<8x128xf32> -> vector<8x128xf32>
    %c0_40 = arith.constant 0 : index
    %c0_41 = arith.constant 0 : index
    %c0_42 = arith.constant 0 : index
    %99 = vector.load %arg5[%c0_40, %c0_41, %c0_42] : memref<2x1x128xf32, #tpu.memory_space<vmem>>, vector<1x1x128xf32>
    %100 = vector.shape_cast %99 : vector<1x1x128xf32> to vector<1x128xf32>
    %101 = vector.broadcast %100 : vector<1x128xf32> to vector<8x128xf32>
    %102 = arith.addf %98, %101 : vector<8x128xf32>
    %103 = arith.negf %102 : vector<8x128xf32>
    %104 = math.exp %103 : vector<8x128xf32>
    %cst_43 = arith.constant 1.000000e+00 : f32
    %105 = vector.broadcast %cst_43 : f32 to vector<8x128xf32>
    %106 = arith.addf %105, %104 : vector<8x128xf32>
    %107 = arith.divf %105, %106 : vector<8x128xf32>
    %108 = math.tanh %102 : vector<8x128xf32>
    %109 = vector.extract_strided_slice %107 {offsets = [0, 0], sizes = [8, 32], strides = [1, 1]} : vector<8x128xf32> to vector<8x32xf32>
    %110 = vector.extract_strided_slice %107 {offsets = [0, 32], sizes = [8, 32], strides = [1, 1]} : vector<8x128xf32> to vector<8x32xf32>
    %111 = vector.extract_strided_slice %108 {offsets = [0, 64], sizes = [8, 32], strides = [1, 1]} : vector<8x128xf32> to vector<8x32xf32>
    %112 = vector.extract_strided_slice %107 {offsets = [0, 96], sizes = [8, 32], strides = [1, 1]} : vector<8x128xf32> to vector<8x32xf32>
    %113 = arith.mulf %110, %32 : vector<8x32xf32>
    %114 = arith.mulf %109, %111 : vector<8x32xf32>
    %115 = arith.addf %113, %114 : vector<8x32xf32>
    %116 = math.tanh %115 : vector<8x32xf32>
    %117 = arith.mulf %112, %116 : vector<8x32xf32>
    %118 = tpu.concatenate %117, %58 in 1 : vector<8x32xf32>, vector<8x32xf32> -> vector<8x64xf32>
    %119 = arith.truncf %118 : vector<8x64xf32> to vector<8x64xbf16>
    %c1_44 = arith.constant 1 : index
    %c0_45 = arith.constant 0 : index
    %c0_46 = arith.constant 0 : index
    %120 = vector.load %arg4[%c1_44, %c0_45, %c0_46] : memref<2x64x128xbf16, #tpu.memory_space<vmem>>, vector<1x64x128xbf16>
    %121 = vector.shape_cast %120 : vector<1x64x128xbf16> to vector<64x128xbf16>
    %cst_47 = arith.constant dense<0.000000e+00> : vector<8x128xf32>
    %122 = tpu.matmul %119, %121, %cst_47 {dimension_numbers = #tpu.dot_dimension_numbers<[1], [0], [0], [1], [0, 0, 1, 1], [], []>} : vector<8x64xbf16>, vector<64x128xbf16>, vector<8x128xf32> -> vector<8x128xf32>
    %c1_48 = arith.constant 1 : index
    %c0_49 = arith.constant 0 : index
    %c0_50 = arith.constant 0 : index
    %123 = vector.load %arg5[%c1_48, %c0_49, %c0_50] : memref<2x1x128xf32, #tpu.memory_space<vmem>>, vector<1x1x128xf32>
    %124 = vector.shape_cast %123 : vector<1x1x128xf32> to vector<1x128xf32>
    %125 = vector.broadcast %124 : vector<1x128xf32> to vector<8x128xf32>
    %126 = arith.addf %122, %125 : vector<8x128xf32>
    %127 = arith.negf %126 : vector<8x128xf32>
    %128 = math.exp %127 : vector<8x128xf32>
    %cst_51 = arith.constant 1.000000e+00 : f32
    %129 = vector.broadcast %cst_51 : f32 to vector<8x128xf32>
    %130 = arith.addf %129, %128 : vector<8x128xf32>
    %131 = arith.divf %129, %130 : vector<8x128xf32>
    %132 = math.tanh %126 : vector<8x128xf32>
    %133 = vector.extract_strided_slice %131 {offsets = [0, 0], sizes = [8, 32], strides = [1, 1]} : vector<8x128xf32> to vector<8x32xf32>
    %134 = vector.extract_strided_slice %131 {offsets = [0, 32], sizes = [8, 32], strides = [1, 1]} : vector<8x128xf32> to vector<8x32xf32>
    %135 = vector.extract_strided_slice %132 {offsets = [0, 64], sizes = [8, 32], strides = [1, 1]} : vector<8x128xf32> to vector<8x32xf32>
    %136 = vector.extract_strided_slice %131 {offsets = [0, 96], sizes = [8, 32], strides = [1, 1]} : vector<8x128xf32> to vector<8x32xf32>
    %137 = arith.mulf %134, %56 : vector<8x32xf32>
    %138 = arith.mulf %133, %135 : vector<8x32xf32>
    %139 = arith.addf %137, %138 : vector<8x32xf32>
    %140 = math.tanh %139 : vector<8x32xf32>
    %141 = arith.mulf %136, %140 : vector<8x32xf32>
    %142 = arith.truncf %141 : vector<8x32xf32> to vector<8x32xbf16>
    %c0_52 = arith.constant 0 : index
    %c0_53 = arith.constant 0 : index
    %c0_54 = arith.constant 0 : index
    %143 = vector.load %arg8[%c0_52, %c0_53, %c0_54] : memref<3x32x4xbf16, #tpu.memory_space<vmem>>, vector<1x32x4xbf16>
    %144 = vector.shape_cast %143 : vector<1x32x4xbf16> to vector<32x4xbf16>
    %cst_55 = arith.constant dense<0.000000e+00> : vector<8x4xf32>
    %145 = tpu.matmul %142, %144, %cst_55 {dimension_numbers = #tpu.dot_dimension_numbers<[1], [0], [0], [1], [0, 0, 1, 1], [], []>} : vector<8x32xbf16>, vector<32x4xbf16>, vector<8x4xf32> -> vector<8x4xf32>
    %c0_56 = arith.constant 0 : index
    %c0_57 = arith.constant 0 : index
    %c0_58 = arith.constant 0 : index
    %146 = vector.load %arg9[%c0_56, %c0_57, %c0_58] : memref<3x1x4xf32, #tpu.memory_space<vmem>>, vector<1x1x4xf32>
    %147 = vector.shape_cast %146 : vector<1x1x4xf32> to vector<1x4xf32>
    %148 = vector.broadcast %147 : vector<1x4xf32> to vector<8x4xf32>
    %149 = arith.addf %145, %148 : vector<8x4xf32>
    %c0_59 = arith.constant 0 : index
    %c0_60 = arith.constant 0 : index
    %150 = vector.load %arg2[%c0_59, %c0_60] : memref<8x3xi32, #tpu.memory_space<vmem>>, vector<8x1xi32>
    %cst_61 = arith.constant dense<0xFF800000> : vector<8xf32>
    %151 = vector.multi_reduction <maximumf>, %149, %cst_61 [1] : vector<8x4xf32> to vector<8xf32>
    %152 = vector.shape_cast %151 : vector<8xf32> to vector<8x1xf32>
    %153 = vector.broadcast %152 : vector<8x1xf32> to vector<8x4xf32>
    %154 = arith.subf %149, %153 : vector<8x4xf32>
    %155 = math.exp %154 : vector<8x4xf32>
    %cst_62 = arith.constant dense<0.000000e+00> : vector<8xf32>
    %156 = vector.multi_reduction <add>, %155, %cst_62 [1] : vector<8x4xf32> to vector<8xf32>
    %157 = vector.shape_cast %156 : vector<8xf32> to vector<8x1xf32>
    %158 = math.log %157 : vector<8x1xf32>
    %159 = vector.broadcast %158 : vector<8x1xf32> to vector<8x4xf32>
    %160 = arith.subf %154, %159 : vector<8x4xf32>
    %161 = tpu.reciprocal %157 {approx = true} : vector<8x1xf32> -> vector<8x1xf32>
    %162 = vector.broadcast %161 : vector<8x1xf32> to vector<8x4xf32>
    %163 = arith.mulf %155, %162 : vector<8x4xf32>
    %164 = arith.mulf %163, %160 : vector<8x4xf32>
    %cst_63 = arith.constant dense<0.000000e+00> : vector<8xf32>
    %165 = vector.multi_reduction <add>, %164, %cst_63 [1] : vector<8x4xf32> to vector<8xf32>
    %166 = vector.shape_cast %165 : vector<8xf32> to vector<8x1xf32>
    %cst_64 = arith.constant 0.000000e+00 : f32
    %167 = vector.broadcast %cst_64 : f32 to vector<8x1xf32>
    %168 = arith.subf %167, %166 : vector<8x1xf32>
    %169 = vector.broadcast %150 : vector<8x1xi32> to vector<8x4xi32>
    %170 = arith.cmpi eq, %10, %169 : vector<8x4xi32>
    %cst_65 = arith.constant 0.000000e+00 : f32
    %171 = vector.broadcast %cst_65 : f32 to vector<8x4xf32>
    %172 = arith.select %170, %160, %171 : vector<8x4xi1>, vector<8x4xf32>
    %cst_66 = arith.constant dense<0.000000e+00> : vector<8xf32>
    %173 = vector.multi_reduction <add>, %172, %cst_66 [1] : vector<8x4xf32> to vector<8xf32>
    %174 = vector.shape_cast %173 : vector<8xf32> to vector<8x1xf32>
    %c1_i32 = arith.constant 1 : i32
    %175 = vector.broadcast %c1_i32 : i32 to vector<8x1xi32>
    %176 = arith.cmpi eq, %67, %175 : vector<8x1xi32>
    %177 = arith.extui %176 : vector<8x1xi1> to vector<8x1xi32>
    %178 = arith.sitofp %177 : vector<8x1xi32> to vector<8x1xf32>
    %179 = arith.mulf %178, %168 : vector<8x1xf32>
    %180 = arith.addf %92, %179 : vector<8x1xf32>
    %181 = arith.mulf %178, %174 : vector<8x1xf32>
    %182 = arith.addf %93, %181 : vector<8x1xf32>
    %183 = vector.shape_cast %176 : vector<8x1xi1> to vector<8x1xi1>
    %184 = vector.broadcast %183 : vector<8x1xi1> to vector<8x32xi1>
    %185 = arith.select %184, %141, %58 : vector<8x32xi1>, vector<8x32xf32>
    %186 = vector.shape_cast %176 : vector<8x1xi1> to vector<8x1xi1>
    %187 = vector.broadcast %186 : vector<8x1xi1> to vector<8x32xi1>
    %188 = arith.select %187, %117, %34 : vector<8x32xi1>, vector<8x32xf32>
    %189 = vector.shape_cast %176 : vector<8x1xi1> to vector<8x1xi1>
    %190 = vector.broadcast %189 : vector<8x1xi1> to vector<8x32xi1>
    %191 = arith.select %190, %141, %58 : vector<8x32xi1>, vector<8x32xf32>
    %192 = vector.shape_cast %176 : vector<8x1xi1> to vector<8x1xi1>
    %193 = vector.broadcast %192 : vector<8x1xi1> to vector<8x32xi1>
    %194 = arith.select %193, %115, %32 : vector<8x32xi1>, vector<8x32xf32>
    %195 = vector.shape_cast %176 : vector<8x1xi1> to vector<8x1xi1>
    %196 = vector.broadcast %195 : vector<8x1xi1> to vector<8x32xi1>
    %197 = arith.select %196, %139, %56 : vector<8x32xi1>, vector<8x32xf32>
    %198 = tpu.concatenate %185, %188 in 1 : vector<8x32xf32>, vector<8x32xf32> -> vector<8x64xf32>
    %199 = arith.truncf %198 : vector<8x64xf32> to vector<8x64xbf16>
    %c0_67 = arith.constant 0 : index
    %c0_68 = arith.constant 0 : index
    %c0_69 = arith.constant 0 : index
    %200 = vector.load %arg4[%c0_67, %c0_68, %c0_69] : memref<2x64x128xbf16, #tpu.memory_space<vmem>>, vector<1x64x128xbf16>
    %201 = vector.shape_cast %200 : vector<1x64x128xbf16> to vector<64x128xbf16>
    %cst_70 = arith.constant dense<0.000000e+00> : vector<8x128xf32>
    %202 = tpu.matmul %199, %201, %cst_70 {dimension_numbers = #tpu.dot_dimension_numbers<[1], [0], [0], [1], [0, 0, 1, 1], [], []>} : vector<8x64xbf16>, vector<64x128xbf16>, vector<8x128xf32> -> vector<8x128xf32>
    %c0_71 = arith.constant 0 : index
    %c0_72 = arith.constant 0 : index
    %c0_73 = arith.constant 0 : index
    %203 = vector.load %arg5[%c0_71, %c0_72, %c0_73] : memref<2x1x128xf32, #tpu.memory_space<vmem>>, vector<1x1x128xf32>
    %204 = vector.shape_cast %203 : vector<1x1x128xf32> to vector<1x128xf32>
    %205 = vector.broadcast %204 : vector<1x128xf32> to vector<8x128xf32>
    %206 = arith.addf %202, %205 : vector<8x128xf32>
    %207 = arith.negf %206 : vector<8x128xf32>
    %208 = math.exp %207 : vector<8x128xf32>
    %cst_74 = arith.constant 1.000000e+00 : f32
    %209 = vector.broadcast %cst_74 : f32 to vector<8x128xf32>
    %210 = arith.addf %209, %208 : vector<8x128xf32>
    %211 = arith.divf %209, %210 : vector<8x128xf32>
    %212 = math.tanh %206 : vector<8x128xf32>
    %213 = vector.extract_strided_slice %211 {offsets = [0, 0], sizes = [8, 32], strides = [1, 1]} : vector<8x128xf32> to vector<8x32xf32>
    %214 = vector.extract_strided_slice %211 {offsets = [0, 32], sizes = [8, 32], strides = [1, 1]} : vector<8x128xf32> to vector<8x32xf32>
    %215 = vector.extract_strided_slice %212 {offsets = [0, 64], sizes = [8, 32], strides = [1, 1]} : vector<8x128xf32> to vector<8x32xf32>
    %216 = vector.extract_strided_slice %211 {offsets = [0, 96], sizes = [8, 32], strides = [1, 1]} : vector<8x128xf32> to vector<8x32xf32>
    %217 = arith.mulf %214, %194 : vector<8x32xf32>
    %218 = arith.mulf %213, %215 : vector<8x32xf32>
    %219 = arith.addf %217, %218 : vector<8x32xf32>
    %220 = math.tanh %219 : vector<8x32xf32>
    %221 = arith.mulf %216, %220 : vector<8x32xf32>
    %222 = tpu.concatenate %221, %191 in 1 : vector<8x32xf32>, vector<8x32xf32> -> vector<8x64xf32>
    %223 = arith.truncf %222 : vector<8x64xf32> to vector<8x64xbf16>
    %c1_75 = arith.constant 1 : index
    %c0_76 = arith.constant 0 : index
    %c0_77 = arith.constant 0 : index
    %224 = vector.load %arg4[%c1_75, %c0_76, %c0_77] : memref<2x64x128xbf16, #tpu.memory_space<vmem>>, vector<1x64x128xbf16>
    %225 = vector.shape_cast %224 : vector<1x64x128xbf16> to vector<64x128xbf16>
    %cst_78 = arith.constant dense<0.000000e+00> : vector<8x128xf32>
    %226 = tpu.matmul %223, %225, %cst_78 {dimension_numbers = #tpu.dot_dimension_numbers<[1], [0], [0], [1], [0, 0, 1, 1], [], []>} : vector<8x64xbf16>, vector<64x128xbf16>, vector<8x128xf32> -> vector<8x128xf32>
    %c1_79 = arith.constant 1 : index
    %c0_80 = arith.constant 0 : index
    %c0_81 = arith.constant 0 : index
    %227 = vector.load %arg5[%c1_79, %c0_80, %c0_81] : memref<2x1x128xf32, #tpu.memory_space<vmem>>, vector<1x1x128xf32>
    %228 = vector.shape_cast %227 : vector<1x1x128xf32> to vector<1x128xf32>
    %229 = vector.broadcast %228 : vector<1x128xf32> to vector<8x128xf32>
    %230 = arith.addf %226, %229 : vector<8x128xf32>
    %231 = arith.negf %230 : vector<8x128xf32>
    %232 = math.exp %231 : vector<8x128xf32>
    %cst_82 = arith.constant 1.000000e+00 : f32
    %233 = vector.broadcast %cst_82 : f32 to vector<8x128xf32>
    %234 = arith.addf %233, %232 : vector<8x128xf32>
    %235 = arith.divf %233, %234 : vector<8x128xf32>
    %236 = math.tanh %230 : vector<8x128xf32>
    %237 = vector.extract_strided_slice %235 {offsets = [0, 0], sizes = [8, 32], strides = [1, 1]} : vector<8x128xf32> to vector<8x32xf32>
    %238 = vector.extract_strided_slice %235 {offsets = [0, 32], sizes = [8, 32], strides = [1, 1]} : vector<8x128xf32> to vector<8x32xf32>
    %239 = vector.extract_strided_slice %236 {offsets = [0, 64], sizes = [8, 32], strides = [1, 1]} : vector<8x128xf32> to vector<8x32xf32>
    %240 = vector.extract_strided_slice %235 {offsets = [0, 96], sizes = [8, 32], strides = [1, 1]} : vector<8x128xf32> to vector<8x32xf32>
    %241 = arith.mulf %238, %197 : vector<8x32xf32>
    %242 = arith.mulf %237, %239 : vector<8x32xf32>
    %243 = arith.addf %241, %242 : vector<8x32xf32>
    %244 = math.tanh %243 : vector<8x32xf32>
    %245 = arith.mulf %240, %244 : vector<8x32xf32>
    %246 = arith.truncf %245 : vector<8x32xf32> to vector<8x32xbf16>
    %c1_83 = arith.constant 1 : index
    %c0_84 = arith.constant 0 : index
    %c0_85 = arith.constant 0 : index
    %247 = vector.load %arg6[%c1_83, %c0_84, %c0_85] : memref<3x32x8xbf16, #tpu.memory_space<vmem>>, vector<1x32x8xbf16>
    %248 = vector.shape_cast %247 : vector<1x32x8xbf16> to vector<32x8xbf16>
    %cst_86 = arith.constant dense<0.000000e+00> : vector<8x8xf32>
    %249 = tpu.matmul %246, %248, %cst_86 {dimension_numbers = #tpu.dot_dimension_numbers<[1], [0], [0], [1], [0, 0, 1, 1], [], []>} : vector<8x32xbf16>, vector<32x8xbf16>, vector<8x8xf32> -> vector<8x8xf32>
    %c1_87 = arith.constant 1 : index
    %c0_88 = arith.constant 0 : index
    %c0_89 = arith.constant 0 : index
    %250 = vector.load %arg7[%c1_87, %c0_88, %c0_89] : memref<3x1x8xf32, #tpu.memory_space<vmem>>, vector<1x1x8xf32>
    %251 = vector.shape_cast %250 : vector<1x1x8xf32> to vector<1x8xf32>
    %252 = vector.broadcast %251 : vector<1x8xf32> to vector<8x8xf32>
    %253 = arith.addf %249, %252 : vector<8x8xf32>
    %c0_90 = arith.constant 0 : index
    %c1_91 = arith.constant 1 : index
    %254 = vector.load %arg1[%c0_90, %c1_91] : memref<8x3xi32, #tpu.memory_space<vmem>>, vector<8x1xi32>
    %cst_92 = arith.constant dense<0xFF800000> : vector<8xf32>
    %255 = vector.multi_reduction <maximumf>, %253, %cst_92 [1] : vector<8x8xf32> to vector<8xf32>
    %256 = vector.shape_cast %255 : vector<8xf32> to vector<8x1xf32>
    %257 = vector.broadcast %256 : vector<8x1xf32> to vector<8x8xf32>
    %258 = arith.subf %253, %257 : vector<8x8xf32>
    %259 = math.exp %258 : vector<8x8xf32>
    %cst_93 = arith.constant dense<0.000000e+00> : vector<8xf32>
    %260 = vector.multi_reduction <add>, %259, %cst_93 [1] : vector<8x8xf32> to vector<8xf32>
    %261 = vector.shape_cast %260 : vector<8xf32> to vector<8x1xf32>
    %262 = math.log %261 : vector<8x1xf32>
    %263 = vector.broadcast %262 : vector<8x1xf32> to vector<8x8xf32>
    %264 = arith.subf %258, %263 : vector<8x8xf32>
    %265 = tpu.reciprocal %261 {approx = true} : vector<8x1xf32> -> vector<8x1xf32>
    %266 = vector.broadcast %265 : vector<8x1xf32> to vector<8x8xf32>
    %267 = arith.mulf %259, %266 : vector<8x8xf32>
    %268 = arith.mulf %267, %264 : vector<8x8xf32>
    %cst_94 = arith.constant dense<0.000000e+00> : vector<8xf32>
    %269 = vector.multi_reduction <add>, %268, %cst_94 [1] : vector<8x8xf32> to vector<8xf32>
    %270 = vector.shape_cast %269 : vector<8xf32> to vector<8x1xf32>
    %cst_95 = arith.constant 0.000000e+00 : f32
    %271 = vector.broadcast %cst_95 : f32 to vector<8x1xf32>
    %272 = arith.subf %271, %270 : vector<8x1xf32>
    %273 = vector.broadcast %254 : vector<8x1xi32> to vector<8x8xi32>
    %274 = arith.cmpi eq, %9, %273 : vector<8x8xi32>
    %cst_96 = arith.constant 0.000000e+00 : f32
    %275 = vector.broadcast %cst_96 : f32 to vector<8x8xf32>
    %276 = arith.select %274, %264, %275 : vector<8x8xi1>, vector<8x8xf32>
    %cst_97 = arith.constant dense<0.000000e+00> : vector<8xf32>
    %277 = vector.multi_reduction <add>, %276, %cst_97 [1] : vector<8x8xf32> to vector<8xf32>
    %278 = vector.shape_cast %277 : vector<8xf32> to vector<8x1xf32>
    %279 = arith.addf %180, %272 : vector<8x1xf32>
    %280 = arith.addf %182, %278 : vector<8x1xf32>
    %281 = tpu.concatenate %245, %221 in 1 : vector<8x32xf32>, vector<8x32xf32> -> vector<8x64xf32>
    %282 = arith.truncf %281 : vector<8x64xf32> to vector<8x64xbf16>
    %c0_98 = arith.constant 0 : index
    %c0_99 = arith.constant 0 : index
    %c0_100 = arith.constant 0 : index
    %283 = vector.load %arg4[%c0_98, %c0_99, %c0_100] : memref<2x64x128xbf16, #tpu.memory_space<vmem>>, vector<1x64x128xbf16>
    %284 = vector.shape_cast %283 : vector<1x64x128xbf16> to vector<64x128xbf16>
    %cst_101 = arith.constant dense<0.000000e+00> : vector<8x128xf32>
    %285 = tpu.matmul %282, %284, %cst_101 {dimension_numbers = #tpu.dot_dimension_numbers<[1], [0], [0], [1], [0, 0, 1, 1], [], []>} : vector<8x64xbf16>, vector<64x128xbf16>, vector<8x128xf32> -> vector<8x128xf32>
    %c0_102 = arith.constant 0 : index
    %c0_103 = arith.constant 0 : index
    %c0_104 = arith.constant 0 : index
    %286 = vector.load %arg5[%c0_102, %c0_103, %c0_104] : memref<2x1x128xf32, #tpu.memory_space<vmem>>, vector<1x1x128xf32>
    %287 = vector.shape_cast %286 : vector<1x1x128xf32> to vector<1x128xf32>
    %288 = vector.broadcast %287 : vector<1x128xf32> to vector<8x128xf32>
    %289 = arith.addf %285, %288 : vector<8x128xf32>
    %290 = arith.negf %289 : vector<8x128xf32>
    %291 = math.exp %290 : vector<8x128xf32>
    %cst_105 = arith.constant 1.000000e+00 : f32
    %292 = vector.broadcast %cst_105 : f32 to vector<8x128xf32>
    %293 = arith.addf %292, %291 : vector<8x128xf32>
    %294 = arith.divf %292, %293 : vector<8x128xf32>
    %295 = math.tanh %289 : vector<8x128xf32>
    %296 = vector.extract_strided_slice %294 {offsets = [0, 0], sizes = [8, 32], strides = [1, 1]} : vector<8x128xf32> to vector<8x32xf32>
    %297 = vector.extract_strided_slice %294 {offsets = [0, 32], sizes = [8, 32], strides = [1, 1]} : vector<8x128xf32> to vector<8x32xf32>
    %298 = vector.extract_strided_slice %295 {offsets = [0, 64], sizes = [8, 32], strides = [1, 1]} : vector<8x128xf32> to vector<8x32xf32>
    %299 = vector.extract_strided_slice %294 {offsets = [0, 96], sizes = [8, 32], strides = [1, 1]} : vector<8x128xf32> to vector<8x32xf32>
    %300 = arith.mulf %297, %219 : vector<8x32xf32>
    %301 = arith.mulf %296, %298 : vector<8x32xf32>
    %302 = arith.addf %300, %301 : vector<8x32xf32>
    %303 = math.tanh %302 : vector<8x32xf32>
    %304 = arith.mulf %299, %303 : vector<8x32xf32>
    %305 = tpu.concatenate %304, %245 in 1 : vector<8x32xf32>, vector<8x32xf32> -> vector<8x64xf32>
    %306 = arith.truncf %305 : vector<8x64xf32> to vector<8x64xbf16>
    %c1_106 = arith.constant 1 : index
    %c0_107 = arith.constant 0 : index
    %c0_108 = arith.constant 0 : index
    %307 = vector.load %arg4[%c1_106, %c0_107, %c0_108] : memref<2x64x128xbf16, #tpu.memory_space<vmem>>, vector<1x64x128xbf16>
    %308 = vector.shape_cast %307 : vector<1x64x128xbf16> to vector<64x128xbf16>
    %cst_109 = arith.constant dense<0.000000e+00> : vector<8x128xf32>
    %309 = tpu.matmul %306, %308, %cst_109 {dimension_numbers = #tpu.dot_dimension_numbers<[1], [0], [0], [1], [0, 0, 1, 1], [], []>} : vector<8x64xbf16>, vector<64x128xbf16>, vector<8x128xf32> -> vector<8x128xf32>
    %c1_110 = arith.constant 1 : index
    %c0_111 = arith.constant 0 : index
    %c0_112 = arith.constant 0 : index
    %310 = vector.load %arg5[%c1_110, %c0_111, %c0_112] : memref<2x1x128xf32, #tpu.memory_space<vmem>>, vector<1x1x128xf32>
    %311 = vector.shape_cast %310 : vector<1x1x128xf32> to vector<1x128xf32>
    %312 = vector.broadcast %311 : vector<1x128xf32> to vector<8x128xf32>
    %313 = arith.addf %309, %312 : vector<8x128xf32>
    %314 = arith.negf %313 : vector<8x128xf32>
    %315 = math.exp %314 : vector<8x128xf32>
    %cst_113 = arith.constant 1.000000e+00 : f32
    %316 = vector.broadcast %cst_113 : f32 to vector<8x128xf32>
    %317 = arith.addf %316, %315 : vector<8x128xf32>
    %318 = arith.divf %316, %317 : vector<8x128xf32>
    %319 = math.tanh %313 : vector<8x128xf32>
    %320 = vector.extract_strided_slice %318 {offsets = [0, 0], sizes = [8, 32], strides = [1, 1]} : vector<8x128xf32> to vector<8x32xf32>
    %321 = vector.extract_strided_slice %318 {offsets = [0, 32], sizes = [8, 32], strides = [1, 1]} : vector<8x128xf32> to vector<8x32xf32>
    %322 = vector.extract_strided_slice %319 {offsets = [0, 64], sizes = [8, 32], strides = [1, 1]} : vector<8x128xf32> to vector<8x32xf32>
    %323 = vector.extract_strided_slice %318 {offsets = [0, 96], sizes = [8, 32], strides = [1, 1]} : vector<8x128xf32> to vector<8x32xf32>
    %324 = arith.mulf %321, %243 : vector<8x32xf32>
    %325 = arith.mulf %320, %322 : vector<8x32xf32>
    %326 = arith.addf %324, %325 : vector<8x32xf32>
    %327 = math.tanh %326 : vector<8x32xf32>
    %328 = arith.mulf %323, %327 : vector<8x32xf32>
    %329 = arith.truncf %328 : vector<8x32xf32> to vector<8x32xbf16>
    %c1_114 = arith.constant 1 : index
    %c0_115 = arith.constant 0 : index
    %c0_116 = arith.constant 0 : index
    %330 = vector.load %arg8[%c1_114, %c0_115, %c0_116] : memref<3x32x4xbf16, #tpu.memory_space<vmem>>, vector<1x32x4xbf16>
    %331 = vector.shape_cast %330 : vector<1x32x4xbf16> to vector<32x4xbf16>
    %cst_117 = arith.constant dense<0.000000e+00> : vector<8x4xf32>
    %332 = tpu.matmul %329, %331, %cst_117 {dimension_numbers = #tpu.dot_dimension_numbers<[1], [0], [0], [1], [0, 0, 1, 1], [], []>} : vector<8x32xbf16>, vector<32x4xbf16>, vector<8x4xf32> -> vector<8x4xf32>
    %c1_118 = arith.constant 1 : index
    %c0_119 = arith.constant 0 : index
    %c0_120 = arith.constant 0 : index
    %333 = vector.load %arg9[%c1_118, %c0_119, %c0_120] : memref<3x1x4xf32, #tpu.memory_space<vmem>>, vector<1x1x4xf32>
    %334 = vector.shape_cast %333 : vector<1x1x4xf32> to vector<1x4xf32>
    %335 = vector.broadcast %334 : vector<1x4xf32> to vector<8x4xf32>
    %336 = arith.addf %332, %335 : vector<8x4xf32>
    %c0_121 = arith.constant 0 : index
    %c1_122 = arith.constant 1 : index
    %337 = vector.load %arg2[%c0_121, %c1_122] : memref<8x3xi32, #tpu.memory_space<vmem>>, vector<8x1xi32>
    %cst_123 = arith.constant dense<0xFF800000> : vector<8xf32>
    %338 = vector.multi_reduction <maximumf>, %336, %cst_123 [1] : vector<8x4xf32> to vector<8xf32>
    %339 = vector.shape_cast %338 : vector<8xf32> to vector<8x1xf32>
    %340 = vector.broadcast %339 : vector<8x1xf32> to vector<8x4xf32>
    %341 = arith.subf %336, %340 : vector<8x4xf32>
    %342 = math.exp %341 : vector<8x4xf32>
    %cst_124 = arith.constant dense<0.000000e+00> : vector<8xf32>
    %343 = vector.multi_reduction <add>, %342, %cst_124 [1] : vector<8x4xf32> to vector<8xf32>
    %344 = vector.shape_cast %343 : vector<8xf32> to vector<8x1xf32>
    %345 = math.log %344 : vector<8x1xf32>
    %346 = vector.broadcast %345 : vector<8x1xf32> to vector<8x4xf32>
    %347 = arith.subf %341, %346 : vector<8x4xf32>
    %348 = tpu.reciprocal %344 {approx = true} : vector<8x1xf32> -> vector<8x1xf32>
    %349 = vector.broadcast %348 : vector<8x1xf32> to vector<8x4xf32>
    %350 = arith.mulf %342, %349 : vector<8x4xf32>
    %351 = arith.mulf %350, %347 : vector<8x4xf32>
    %cst_125 = arith.constant dense<0.000000e+00> : vector<8xf32>
    %352 = vector.multi_reduction <add>, %351, %cst_125 [1] : vector<8x4xf32> to vector<8xf32>
    %353 = vector.shape_cast %352 : vector<8xf32> to vector<8x1xf32>
    %cst_126 = arith.constant 0.000000e+00 : f32
    %354 = vector.broadcast %cst_126 : f32 to vector<8x1xf32>
    %355 = arith.subf %354, %353 : vector<8x1xf32>
    %356 = vector.broadcast %337 : vector<8x1xi32> to vector<8x4xi32>
    %357 = arith.cmpi eq, %10, %356 : vector<8x4xi32>
    %cst_127 = arith.constant 0.000000e+00 : f32
    %358 = vector.broadcast %cst_127 : f32 to vector<8x4xf32>
    %359 = arith.select %357, %347, %358 : vector<8x4xi1>, vector<8x4xf32>
    %cst_128 = arith.constant dense<0.000000e+00> : vector<8xf32>
    %360 = vector.multi_reduction <add>, %359, %cst_128 [1] : vector<8x4xf32> to vector<8xf32>
    %361 = vector.shape_cast %360 : vector<8xf32> to vector<8x1xf32>
    %c1_i32_129 = arith.constant 1 : i32
    %362 = vector.broadcast %c1_i32_129 : i32 to vector<8x1xi32>
    %363 = arith.cmpi eq, %254, %362 : vector<8x1xi32>
    %364 = arith.extui %363 : vector<8x1xi1> to vector<8x1xi32>
    %365 = arith.sitofp %364 : vector<8x1xi32> to vector<8x1xf32>
    %366 = arith.mulf %365, %355 : vector<8x1xf32>
    %367 = arith.addf %279, %366 : vector<8x1xf32>
    %368 = arith.mulf %365, %361 : vector<8x1xf32>
    %369 = arith.addf %280, %368 : vector<8x1xf32>
    %370 = vector.shape_cast %363 : vector<8x1xi1> to vector<8x1xi1>
    %371 = vector.broadcast %370 : vector<8x1xi1> to vector<8x32xi1>
    %372 = arith.select %371, %328, %245 : vector<8x32xi1>, vector<8x32xf32>
    %373 = vector.shape_cast %363 : vector<8x1xi1> to vector<8x1xi1>
    %374 = vector.broadcast %373 : vector<8x1xi1> to vector<8x32xi1>
    %375 = arith.select %374, %304, %221 : vector<8x32xi1>, vector<8x32xf32>
    %376 = vector.shape_cast %363 : vector<8x1xi1> to vector<8x1xi1>
    %377 = vector.broadcast %376 : vector<8x1xi1> to vector<8x32xi1>
    %378 = arith.select %377, %328, %245 : vector<8x32xi1>, vector<8x32xf32>
    %379 = vector.shape_cast %363 : vector<8x1xi1> to vector<8x1xi1>
    %380 = vector.broadcast %379 : vector<8x1xi1> to vector<8x32xi1>
    %381 = arith.select %380, %302, %219 : vector<8x32xi1>, vector<8x32xf32>
    %382 = vector.shape_cast %363 : vector<8x1xi1> to vector<8x1xi1>
    %383 = vector.broadcast %382 : vector<8x1xi1> to vector<8x32xi1>
    %384 = arith.select %383, %326, %243 : vector<8x32xi1>, vector<8x32xf32>
    %385 = tpu.concatenate %372, %375 in 1 : vector<8x32xf32>, vector<8x32xf32> -> vector<8x64xf32>
    %386 = arith.truncf %385 : vector<8x64xf32> to vector<8x64xbf16>
    %c0_130 = arith.constant 0 : index
    %c0_131 = arith.constant 0 : index
    %c0_132 = arith.constant 0 : index
    %387 = vector.load %arg4[%c0_130, %c0_131, %c0_132] : memref<2x64x128xbf16, #tpu.memory_space<vmem>>, vector<1x64x128xbf16>
    %388 = vector.shape_cast %387 : vector<1x64x128xbf16> to vector<64x128xbf16>
    %cst_133 = arith.constant dense<0.000000e+00> : vector<8x128xf32>
    %389 = tpu.matmul %386, %388, %cst_133 {dimension_numbers = #tpu.dot_dimension_numbers<[1], [0], [0], [1], [0, 0, 1, 1], [], []>} : vector<8x64xbf16>, vector<64x128xbf16>, vector<8x128xf32> -> vector<8x128xf32>
    %c0_134 = arith.constant 0 : index
    %c0_135 = arith.constant 0 : index
    %c0_136 = arith.constant 0 : index
    %390 = vector.load %arg5[%c0_134, %c0_135, %c0_136] : memref<2x1x128xf32, #tpu.memory_space<vmem>>, vector<1x1x128xf32>
    %391 = vector.shape_cast %390 : vector<1x1x128xf32> to vector<1x128xf32>
    %392 = vector.broadcast %391 : vector<1x128xf32> to vector<8x128xf32>
    %393 = arith.addf %389, %392 : vector<8x128xf32>
    %394 = arith.negf %393 : vector<8x128xf32>
    %395 = math.exp %394 : vector<8x128xf32>
    %cst_137 = arith.constant 1.000000e+00 : f32
    %396 = vector.broadcast %cst_137 : f32 to vector<8x128xf32>
    %397 = arith.addf %396, %395 : vector<8x128xf32>
    %398 = arith.divf %396, %397 : vector<8x128xf32>
    %399 = math.tanh %393 : vector<8x128xf32>
    %400 = vector.extract_strided_slice %398 {offsets = [0, 0], sizes = [8, 32], strides = [1, 1]} : vector<8x128xf32> to vector<8x32xf32>
    %401 = vector.extract_strided_slice %398 {offsets = [0, 32], sizes = [8, 32], strides = [1, 1]} : vector<8x128xf32> to vector<8x32xf32>
    %402 = vector.extract_strided_slice %399 {offsets = [0, 64], sizes = [8, 32], strides = [1, 1]} : vector<8x128xf32> to vector<8x32xf32>
    %403 = vector.extract_strided_slice %398 {offsets = [0, 96], sizes = [8, 32], strides = [1, 1]} : vector<8x128xf32> to vector<8x32xf32>
    %404 = arith.mulf %401, %381 : vector<8x32xf32>
    %405 = arith.mulf %400, %402 : vector<8x32xf32>
    %406 = arith.addf %404, %405 : vector<8x32xf32>
    %407 = math.tanh %406 : vector<8x32xf32>
    %408 = arith.mulf %403, %407 : vector<8x32xf32>
    %409 = tpu.concatenate %408, %378 in 1 : vector<8x32xf32>, vector<8x32xf32> -> vector<8x64xf32>
    %410 = arith.truncf %409 : vector<8x64xf32> to vector<8x64xbf16>
    %c1_138 = arith.constant 1 : index
    %c0_139 = arith.constant 0 : index
    %c0_140 = arith.constant 0 : index
    %411 = vector.load %arg4[%c1_138, %c0_139, %c0_140] : memref<2x64x128xbf16, #tpu.memory_space<vmem>>, vector<1x64x128xbf16>
    %412 = vector.shape_cast %411 : vector<1x64x128xbf16> to vector<64x128xbf16>
    %cst_141 = arith.constant dense<0.000000e+00> : vector<8x128xf32>
    %413 = tpu.matmul %410, %412, %cst_141 {dimension_numbers = #tpu.dot_dimension_numbers<[1], [0], [0], [1], [0, 0, 1, 1], [], []>} : vector<8x64xbf16>, vector<64x128xbf16>, vector<8x128xf32> -> vector<8x128xf32>
    %c1_142 = arith.constant 1 : index
    %c0_143 = arith.constant 0 : index
    %c0_144 = arith.constant 0 : index
    %414 = vector.load %arg5[%c1_142, %c0_143, %c0_144] : memref<2x1x128xf32, #tpu.memory_space<vmem>>, vector<1x1x128xf32>
    %415 = vector.shape_cast %414 : vector<1x1x128xf32> to vector<1x128xf32>
    %416 = vector.broadcast %415 : vector<1x128xf32> to vector<8x128xf32>
    %417 = arith.addf %413, %416 : vector<8x128xf32>
    %418 = arith.negf %417 : vector<8x128xf32>
    %419 = math.exp %418 : vector<8x128xf32>
    %cst_145 = arith.constant 1.000000e+00 : f32
    %420 = vector.broadcast %cst_145 : f32 to vector<8x128xf32>
    %421 = arith.addf %420, %419 : vector<8x128xf32>
    %422 = arith.divf %420, %421 : vector<8x128xf32>
    %423 = math.tanh %417 : vector<8x128xf32>
    %424 = vector.extract_strided_slice %422 {offsets = [0, 0], sizes = [8, 32], strides = [1, 1]} : vector<8x128xf32> to vector<8x32xf32>
    %425 = vector.extract_strided_slice %422 {offsets = [0, 32], sizes = [8, 32], strides = [1, 1]} : vector<8x128xf32> to vector<8x32xf32>
    %426 = vector.extract_strided_slice %423 {offsets = [0, 64], sizes = [8, 32], strides = [1, 1]} : vector<8x128xf32> to vector<8x32xf32>
    %427 = vector.extract_strided_slice %422 {offsets = [0, 96], sizes = [8, 32], strides = [1, 1]} : vector<8x128xf32> to vector<8x32xf32>
    %428 = arith.mulf %425, %384 : vector<8x32xf32>
    %429 = arith.mulf %424, %426 : vector<8x32xf32>
    %430 = arith.addf %428, %429 : vector<8x32xf32>
    %431 = math.tanh %430 : vector<8x32xf32>
    %432 = arith.mulf %427, %431 : vector<8x32xf32>
    %433 = arith.truncf %432 : vector<8x32xf32> to vector<8x32xbf16>
    %c2 = arith.constant 2 : index
    %c0_146 = arith.constant 0 : index
    %c0_147 = arith.constant 0 : index
    %434 = vector.load %arg6[%c2, %c0_146, %c0_147] : memref<3x32x8xbf16, #tpu.memory_space<vmem>>, vector<1x32x8xbf16>
    %435 = vector.shape_cast %434 : vector<1x32x8xbf16> to vector<32x8xbf16>
    %cst_148 = arith.constant dense<0.000000e+00> : vector<8x8xf32>
    %436 = tpu.matmul %433, %435, %cst_148 {dimension_numbers = #tpu.dot_dimension_numbers<[1], [0], [0], [1], [0, 0, 1, 1], [], []>} : vector<8x32xbf16>, vector<32x8xbf16>, vector<8x8xf32> -> vector<8x8xf32>
    %c2_149 = arith.constant 2 : index
    %c0_150 = arith.constant 0 : index
    %c0_151 = arith.constant 0 : index
    %437 = vector.load %arg7[%c2_149, %c0_150, %c0_151] : memref<3x1x8xf32, #tpu.memory_space<vmem>>, vector<1x1x8xf32>
    %438 = vector.shape_cast %437 : vector<1x1x8xf32> to vector<1x8xf32>
    %439 = vector.broadcast %438 : vector<1x8xf32> to vector<8x8xf32>
    %440 = arith.addf %436, %439 : vector<8x8xf32>
    %c0_152 = arith.constant 0 : index
    %c2_153 = arith.constant 2 : index
    %441 = vector.load %arg1[%c0_152, %c2_153] : memref<8x3xi32, #tpu.memory_space<vmem>>, vector<8x1xi32>
    %cst_154 = arith.constant dense<0xFF800000> : vector<8xf32>
    %442 = vector.multi_reduction <maximumf>, %440, %cst_154 [1] : vector<8x8xf32> to vector<8xf32>
    %443 = vector.shape_cast %442 : vector<8xf32> to vector<8x1xf32>
    %444 = vector.broadcast %443 : vector<8x1xf32> to vector<8x8xf32>
    %445 = arith.subf %440, %444 : vector<8x8xf32>
    %446 = math.exp %445 : vector<8x8xf32>
    %cst_155 = arith.constant dense<0.000000e+00> : vector<8xf32>
    %447 = vector.multi_reduction <add>, %446, %cst_155 [1] : vector<8x8xf32> to vector<8xf32>
    %448 = vector.shape_cast %447 : vector<8xf32> to vector<8x1xf32>
    %449 = math.log %448 : vector<8x1xf32>
    %450 = vector.broadcast %449 : vector<8x1xf32> to vector<8x8xf32>
    %451 = arith.subf %445, %450 : vector<8x8xf32>
    %452 = tpu.reciprocal %448 {approx = true} : vector<8x1xf32> -> vector<8x1xf32>
    %453 = vector.broadcast %452 : vector<8x1xf32> to vector<8x8xf32>
    %454 = arith.mulf %446, %453 : vector<8x8xf32>
    %455 = arith.mulf %454, %451 : vector<8x8xf32>
    %cst_156 = arith.constant dense<0.000000e+00> : vector<8xf32>
    %456 = vector.multi_reduction <add>, %455, %cst_156 [1] : vector<8x8xf32> to vector<8xf32>
    %457 = vector.shape_cast %456 : vector<8xf32> to vector<8x1xf32>
    %cst_157 = arith.constant 0.000000e+00 : f32
    %458 = vector.broadcast %cst_157 : f32 to vector<8x1xf32>
    %459 = arith.subf %458, %457 : vector<8x1xf32>
    %460 = vector.broadcast %441 : vector<8x1xi32> to vector<8x8xi32>
    %461 = arith.cmpi eq, %9, %460 : vector<8x8xi32>
    %cst_158 = arith.constant 0.000000e+00 : f32
    %462 = vector.broadcast %cst_158 : f32 to vector<8x8xf32>
    %463 = arith.select %461, %451, %462 : vector<8x8xi1>, vector<8x8xf32>
    %cst_159 = arith.constant dense<0.000000e+00> : vector<8xf32>
    %464 = vector.multi_reduction <add>, %463, %cst_159 [1] : vector<8x8xf32> to vector<8xf32>
    %465 = vector.shape_cast %464 : vector<8xf32> to vector<8x1xf32>
    %466 = arith.addf %367, %459 : vector<8x1xf32>
    %467 = arith.addf %369, %465 : vector<8x1xf32>
    %468 = tpu.concatenate %432, %408 in 1 : vector<8x32xf32>, vector<8x32xf32> -> vector<8x64xf32>
    %469 = arith.truncf %468 : vector<8x64xf32> to vector<8x64xbf16>
    %c0_160 = arith.constant 0 : index
    %c0_161 = arith.constant 0 : index
    %c0_162 = arith.constant 0 : index
    %470 = vector.load %arg4[%c0_160, %c0_161, %c0_162] : memref<2x64x128xbf16, #tpu.memory_space<vmem>>, vector<1x64x128xbf16>
    %471 = vector.shape_cast %470 : vector<1x64x128xbf16> to vector<64x128xbf16>
    %cst_163 = arith.constant dense<0.000000e+00> : vector<8x128xf32>
    %472 = tpu.matmul %469, %471, %cst_163 {dimension_numbers = #tpu.dot_dimension_numbers<[1], [0], [0], [1], [0, 0, 1, 1], [], []>} : vector<8x64xbf16>, vector<64x128xbf16>, vector<8x128xf32> -> vector<8x128xf32>
    %c0_164 = arith.constant 0 : index
    %c0_165 = arith.constant 0 : index
    %c0_166 = arith.constant 0 : index
    %473 = vector.load %arg5[%c0_164, %c0_165, %c0_166] : memref<2x1x128xf32, #tpu.memory_space<vmem>>, vector<1x1x128xf32>
    %474 = vector.shape_cast %473 : vector<1x1x128xf32> to vector<1x128xf32>
    %475 = vector.broadcast %474 : vector<1x128xf32> to vector<8x128xf32>
    %476 = arith.addf %472, %475 : vector<8x128xf32>
    %477 = arith.negf %476 : vector<8x128xf32>
    %478 = math.exp %477 : vector<8x128xf32>
    %cst_167 = arith.constant 1.000000e+00 : f32
    %479 = vector.broadcast %cst_167 : f32 to vector<8x128xf32>
    %480 = arith.addf %479, %478 : vector<8x128xf32>
    %481 = arith.divf %479, %480 : vector<8x128xf32>
    %482 = math.tanh %476 : vector<8x128xf32>
    %483 = vector.extract_strided_slice %481 {offsets = [0, 0], sizes = [8, 32], strides = [1, 1]} : vector<8x128xf32> to vector<8x32xf32>
    %484 = vector.extract_strided_slice %481 {offsets = [0, 32], sizes = [8, 32], strides = [1, 1]} : vector<8x128xf32> to vector<8x32xf32>
    %485 = vector.extract_strided_slice %482 {offsets = [0, 64], sizes = [8, 32], strides = [1, 1]} : vector<8x128xf32> to vector<8x32xf32>
    %486 = vector.extract_strided_slice %481 {offsets = [0, 96], sizes = [8, 32], strides = [1, 1]} : vector<8x128xf32> to vector<8x32xf32>
    %487 = arith.mulf %484, %406 : vector<8x32xf32>
    %488 = arith.mulf %483, %485 : vector<8x32xf32>
    %489 = arith.addf %487, %488 : vector<8x32xf32>
    %490 = math.tanh %489 : vector<8x32xf32>
    %491 = arith.mulf %486, %490 : vector<8x32xf32>
    %492 = tpu.concatenate %491, %432 in 1 : vector<8x32xf32>, vector<8x32xf32> -> vector<8x64xf32>
    %493 = arith.truncf %492 : vector<8x64xf32> to vector<8x64xbf16>
    %c1_168 = arith.constant 1 : index
    %c0_169 = arith.constant 0 : index
    %c0_170 = arith.constant 0 : index
    %494 = vector.load %arg4[%c1_168, %c0_169, %c0_170] : memref<2x64x128xbf16, #tpu.memory_space<vmem>>, vector<1x64x128xbf16>
    %495 = vector.shape_cast %494 : vector<1x64x128xbf16> to vector<64x128xbf16>
    %cst_171 = arith.constant dense<0.000000e+00> : vector<8x128xf32>
    %496 = tpu.matmul %493, %495, %cst_171 {dimension_numbers = #tpu.dot_dimension_numbers<[1], [0], [0], [1], [0, 0, 1, 1], [], []>} : vector<8x64xbf16>, vector<64x128xbf16>, vector<8x128xf32> -> vector<8x128xf32>
    %c1_172 = arith.constant 1 : index
    %c0_173 = arith.constant 0 : index
    %c0_174 = arith.constant 0 : index
    %497 = vector.load %arg5[%c1_172, %c0_173, %c0_174] : memref<2x1x128xf32, #tpu.memory_space<vmem>>, vector<1x1x128xf32>
    %498 = vector.shape_cast %497 : vector<1x1x128xf32> to vector<1x128xf32>
    %499 = vector.broadcast %498 : vector<1x128xf32> to vector<8x128xf32>
    %500 = arith.addf %496, %499 : vector<8x128xf32>
    %501 = arith.negf %500 : vector<8x128xf32>
    %502 = math.exp %501 : vector<8x128xf32>
    %cst_175 = arith.constant 1.000000e+00 : f32
    %503 = vector.broadcast %cst_175 : f32 to vector<8x128xf32>
    %504 = arith.addf %503, %502 : vector<8x128xf32>
    %505 = arith.divf %503, %504 : vector<8x128xf32>
    %506 = math.tanh %500 : vector<8x128xf32>
    %507 = vector.extract_strided_slice %505 {offsets = [0, 0], sizes = [8, 32], strides = [1, 1]} : vector<8x128xf32> to vector<8x32xf32>
    %508 = vector.extract_strided_slice %505 {offsets = [0, 32], sizes = [8, 32], strides = [1, 1]} : vector<8x128xf32> to vector<8x32xf32>
    %509 = vector.extract_strided_slice %506 {offsets = [0, 64], sizes = [8, 32], strides = [1, 1]} : vector<8x128xf32> to vector<8x32xf32>
    %510 = vector.extract_strided_slice %505 {offsets = [0, 96], sizes = [8, 32], strides = [1, 1]} : vector<8x128xf32> to vector<8x32xf32>
    %511 = arith.mulf %508, %430 : vector<8x32xf32>
    %512 = arith.mulf %507, %509 : vector<8x32xf32>
    %513 = arith.addf %511, %512 : vector<8x32xf32>
    %514 = math.tanh %513 : vector<8x32xf32>
    %515 = arith.mulf %510, %514 : vector<8x32xf32>
    %516 = arith.truncf %515 : vector<8x32xf32> to vector<8x32xbf16>
    %c2_176 = arith.constant 2 : index
    %c0_177 = arith.constant 0 : index
    %c0_178 = arith.constant 0 : index
    %517 = vector.load %arg8[%c2_176, %c0_177, %c0_178] : memref<3x32x4xbf16, #tpu.memory_space<vmem>>, vector<1x32x4xbf16>
    %518 = vector.shape_cast %517 : vector<1x32x4xbf16> to vector<32x4xbf16>
    %cst_179 = arith.constant dense<0.000000e+00> : vector<8x4xf32>
    %519 = tpu.matmul %516, %518, %cst_179 {dimension_numbers = #tpu.dot_dimension_numbers<[1], [0], [0], [1], [0, 0, 1, 1], [], []>} : vector<8x32xbf16>, vector<32x4xbf16>, vector<8x4xf32> -> vector<8x4xf32>
    %c2_180 = arith.constant 2 : index
    %c0_181 = arith.constant 0 : index
    %c0_182 = arith.constant 0 : index
    %520 = vector.load %arg9[%c2_180, %c0_181, %c0_182] : memref<3x1x4xf32, #tpu.memory_space<vmem>>, vector<1x1x4xf32>
    %521 = vector.shape_cast %520 : vector<1x1x4xf32> to vector<1x4xf32>
    %522 = vector.broadcast %521 : vector<1x4xf32> to vector<8x4xf32>
    %523 = arith.addf %519, %522 : vector<8x4xf32>
    %c0_183 = arith.constant 0 : index
    %c2_184 = arith.constant 2 : index
    %524 = vector.load %arg2[%c0_183, %c2_184] : memref<8x3xi32, #tpu.memory_space<vmem>>, vector<8x1xi32>
    %cst_185 = arith.constant dense<0xFF800000> : vector<8xf32>
    %525 = vector.multi_reduction <maximumf>, %523, %cst_185 [1] : vector<8x4xf32> to vector<8xf32>
    %526 = vector.shape_cast %525 : vector<8xf32> to vector<8x1xf32>
    %527 = vector.broadcast %526 : vector<8x1xf32> to vector<8x4xf32>
    %528 = arith.subf %523, %527 : vector<8x4xf32>
    %529 = math.exp %528 : vector<8x4xf32>
    %cst_186 = arith.constant dense<0.000000e+00> : vector<8xf32>
    %530 = vector.multi_reduction <add>, %529, %cst_186 [1] : vector<8x4xf32> to vector<8xf32>
    %531 = vector.shape_cast %530 : vector<8xf32> to vector<8x1xf32>
    %532 = math.log %531 : vector<8x1xf32>
    %533 = vector.broadcast %532 : vector<8x1xf32> to vector<8x4xf32>
    %534 = arith.subf %528, %533 : vector<8x4xf32>
    %535 = tpu.reciprocal %531 {approx = true} : vector<8x1xf32> -> vector<8x1xf32>
    %536 = vector.broadcast %535 : vector<8x1xf32> to vector<8x4xf32>
    %537 = arith.mulf %529, %536 : vector<8x4xf32>
    %538 = arith.mulf %537, %534 : vector<8x4xf32>
    %cst_187 = arith.constant dense<0.000000e+00> : vector<8xf32>
    %539 = vector.multi_reduction <add>, %538, %cst_187 [1] : vector<8x4xf32> to vector<8xf32>
    %540 = vector.shape_cast %539 : vector<8xf32> to vector<8x1xf32>
    %cst_188 = arith.constant 0.000000e+00 : f32
    %541 = vector.broadcast %cst_188 : f32 to vector<8x1xf32>
    %542 = arith.subf %541, %540 : vector<8x1xf32>
    %543 = vector.broadcast %524 : vector<8x1xi32> to vector<8x4xi32>
    %544 = arith.cmpi eq, %10, %543 : vector<8x4xi32>
    %cst_189 = arith.constant 0.000000e+00 : f32
    %545 = vector.broadcast %cst_189 : f32 to vector<8x4xf32>
    %546 = arith.select %544, %534, %545 : vector<8x4xi1>, vector<8x4xf32>
    %cst_190 = arith.constant dense<0.000000e+00> : vector<8xf32>
    %547 = vector.multi_reduction <add>, %546, %cst_190 [1] : vector<8x4xf32> to vector<8xf32>
    %548 = vector.shape_cast %547 : vector<8xf32> to vector<8x1xf32>
    %c1_i32_191 = arith.constant 1 : i32
    %549 = vector.broadcast %c1_i32_191 : i32 to vector<8x1xi32>
    %550 = arith.cmpi eq, %441, %549 : vector<8x1xi32>
    %551 = arith.extui %550 : vector<8x1xi1> to vector<8x1xi32>
    %552 = arith.sitofp %551 : vector<8x1xi32> to vector<8x1xf32>
    %553 = arith.mulf %552, %542 : vector<8x1xf32>
    %554 = arith.addf %466, %553 : vector<8x1xf32>
    %555 = arith.mulf %552, %548 : vector<8x1xf32>
    %556 = arith.addf %467, %555 : vector<8x1xf32>
    %c0_192 = arith.constant 0 : index
    %c0_193 = arith.constant 0 : index
    %557 = vector.load %arg10[%c0_192, %c0_193] : memref<8x1xf32, #tpu.memory_space<vmem>>, vector<8x1xf32>
    tpu.vector_store %arg10[%c0_192, %c0_193], %554 {strides = array<i32>} : memref<8x1xf32, #tpu.memory_space<vmem>>, vector<8x1xf32>,
    %c0_194 = arith.constant 0 : index
    %c0_195 = arith.constant 0 : index
    %558 = vector.load %arg11[%c0_194, %c0_195] : memref<8x1xf32, #tpu.memory_space<vmem>>, vector<8x1xf32>
    tpu.vector_store %arg11[%c0_194, %c0_195], %556 {strides = array<i32>} : memref<8x1xf32, #tpu.memory_space<vmem>>, vector<8x1xf32>,
    return
  }
  func.func @transform_0(%arg0: i32) -> (i32, i32) {
    %c0_i32 = arith.constant 0 : i32
    %c0_i32_0 = arith.constant 0 : i32
    return %arg0, %c0_i32 : i32, i32
  }
  func.func @transform_1(%arg0: i32) -> (i32, i32) {
    %c0_i32 = arith.constant 0 : i32
    %c0_i32_0 = arith.constant 0 : i32
    return %arg0, %c0_i32 : i32, i32
  }
  func.func @transform_2(%arg0: i32) -> (i32, i32) {
    %c0_i32 = arith.constant 0 : i32
    %c0_i32_0 = arith.constant 0 : i32
    %c0_i32_1 = arith.constant 0 : i32
    return %c0_i32, %c0_i32_0 : i32, i32
  }
  func.func @transform_3(%arg0: i32) -> (i32, i32, i32) {
    %c0_i32 = arith.constant 0 : i32
    %c0_i32_0 = arith.constant 0 : i32
    %c0_i32_1 = arith.constant 0 : i32
    %c0_i32_2 = arith.constant 0 : i32
    return %c0_i32, %c0_i32_0, %c0_i32_1 : i32, i32, i32
  }
  func.func @transform_4(%arg0: i32) -> (i32, i32, i32) {
    %c0_i32 = arith.constant 0 : i32
    %c0_i32_0 = arith.constant 0 : i32
    %c0_i32_1 = arith.constant 0 : i32
    %c0_i32_2 = arith.constant 0 : i32
    return %c0_i32, %c0_i32_0, %c0_i32_1 : i32, i32, i32
  }
  func.func @transform_5(%arg0: i32) -> (i32, i32, i32) {
    %c0_i32 = arith.constant 0 : i32
    %c0_i32_0 = arith.constant 0 : i32
    %c0_i32_1 = arith.constant 0 : i32
    %c0_i32_2 = arith.constant 0 : i32
    return %c0_i32, %c0_i32_0, %c0_i32_1 : i32, i32, i32
  }
  func.func @transform_6(%arg0: i32) -> (i32, i32, i32) {
    %c0_i32 = arith.constant 0 : i32
    %c0_i32_0 = arith.constant 0 : i32
    %c0_i32_1 = arith.constant 0 : i32
    %c0_i32_2 = arith.constant 0 : i32
    return %c0_i32, %c0_i32_0, %c0_i32_1 : i32, i32, i32
  }
  func.func @transform_7(%arg0: i32) -> (i32, i32, i32) {
    %c0_i32 = arith.constant 0 : i32
    %c0_i32_0 = arith.constant 0 : i32
    %c0_i32_1 = arith.constant 0 : i32
    %c0_i32_2 = arith.constant 0 : i32
    return %c0_i32, %c0_i32_0, %c0_i32_1 : i32, i32, i32
  }
  func.func @transform_8(%arg0: i32) -> (i32, i32, i32) {
    %c0_i32 = arith.constant 0 : i32
    %c0_i32_0 = arith.constant 0 : i32
    %c0_i32_1 = arith.constant 0 : i32
    %c0_i32_2 = arith.constant 0 : i32
    return %c0_i32, %c0_i32_0, %c0_i32_1 : i32, i32, i32
  }
  func.func @transform_9(%arg0: i32) -> (i32, i32) {
    %c0_i32 = arith.constant 0 : i32
    %c0_i32_0 = arith.constant 0 : i32
    return %arg0, %c0_i32 : i32, i32
  }
  func.func @transform_10(%arg0: i32) -> (i32, i32) {
    %c0_i32 = arith.constant 0 : i32
    %c0_i32_0 = arith.constant 0 : i32
    return %arg0, %c0_i32 : i32, i32
  }
}

</mosaic_0001>

<bundles_post_ra>
// kernel: tpu_custom_call.1
= control target key start
LH: loop header
LB: loop body
LE: loop exit
PB: predicated region body
PF: predicated region fallthrough
CT: control target
= control target key end

     0   :  { %s2746_s13 = smov 0   ;;  %s3332_s0 = inlined_call_operand.vmem [shape: s32[16,3], index: 0, kind: input, shape index: {}]   ;;  %s3333_s1 = inlined_call_operand.vmem [shape: s32[16,3], index: 1, kind: input, shape index: {}]   ;;  %s3334_s2 = inlined_call_operand.vmem [shape: f32[1,32], index: 2, kind: input, shape index: {}]   ;;  %s3335_s3 = inlined_call_operand.vmem [shape: bf16[2,64,128], index: 3, kind: input, shape index: {}]   ;;  %s3336_s4 = inlined_call_operand.vmem [shape: f32[2,1,128], index: 4, kind: input, shape index: {}]   ;;  %s3337_s5 = inlined_call_operand.vmem [shape: bf16[3,32,8], index: 5, kind: input, shape index: {}]   ;;  %s3338_s6 = inlined_call_operand.vmem [shape: f32[3,1,8], index: 6, kind: input, shape index: {}]   ;;  %s3339_s7 = inlined_call_operand.vmem [shape: bf16[3,32,4], index: 7, kind: input, shape index: {}]   ;;  %s3340_s8 = inlined_call_operand.vmem [shape: f32[3,1,4], index: 8, kind: input, shape index: {}]   ;;  %s3341_s9 = inlined_call_operand.vmem [shape: f32[16,1], index: 9, kind: output, shape index: {0}]   ;;  %s3342_s10 = inlined_call_operand.vmem [shape: f32[16,1], index: 10, kind: output, shape index: {1}]  }
   0x1 LB: > { %s2125_s14 = sadd.s32 4294967295, %s2680_s13   ;;  %p2129_p0 = scmp.ge.s32.totalorder %s2680_s13, 1  ;;  %s2680_s13 = sphi %s2746_s13, %s21_s13  }
   0x2   : > { %p323_p1 = scmp.lt.s32.totalorder %s2680_s13, 3 }
   0x4   : > { %p324_p2 = pnand %p2129_p0, %p323_p1 }
   0x5   : > { %s2684_s27 = smov (!%p324_p2), 64   ;;  %s2685_s28 = smov (!%p324_p2), 32  }
   0x6   : > { %327 = sbr.rel (%p324_p2) target bundleno = 10225 (0x27f1), region = 56  ;;  %p367_p3 = scmp.lt.s32.totalorder (!%p324_p2), %s2125_s14, 1 }
   0x7   : > { %s2689_s18 = smov (!%p324_p2), 127   ;;  %s2690_s19 = smov (!%p324_p2), 126  }
   0xb   : > { %v2757_v0 = vld [vmem:[%s3335_s3 + $0x18] sm:$0xff]   ;;  %v2682_v1 = vmov 0.0   ;;  %v2765_v2 = vld [vmem:[%s3335_s3 + $0x10] sm:$0xff]   ;;  %vm2683_vm0 = vmmov 0   ;;  %vm393_vm1 = vcmask 261120   ;;  %v2778_v4 = vld [vmem:[%s3335_s3 + $0x8] sm:$0xff]  }
   0xc   : > { %2303 = vmatprep.subr.bf16.mxu0 %v2682_v1  ;;  %2315 = vmatprep.subr.bf16.mxu1 %v2682_v1  ;;  %v2134_v3 = vld [vmem:[%s3334_s2] ss:$0 sm:$0xff]  ;;  %vm435_vm2 = vcmask 523264   ;;  %v2809_v24 = vld [vmem:[%s3335_s3 + $0x38] sm:$0xff]   ;;  %v2815_v25 = vld [vmem:[%s3335_s3 + $0x30] sm:$0xff]   ;;  %s3344_s14 = smov (!%p367_p3, %s2125_s14), 1 }
   0xd   : > { %2304 = vmatpush3.bf16.msra.mxu0 %v2757_v0  ;;  %2311 = vmatprep.mubr.msk.bf16.mxu0 %vm2683_vm0, %v2682_v1  ;;  %v394_v5 = vsel %vm393_vm1, %v2134_v3, 0.0  ;;  %v2786_v6 = vld [vmem:[%s3335_s3] sm:$0xff]   ;;  %v2822_v26 = vld [vmem:[%s3335_s3 + $0x28] sm:$0xff]   ;;  %s2926_s25 = sshll.u32 %s3344_s14, 3  ;;  %vm688_vm6 = vcmask 64512   ;;  %vm941_vm7 = vcmask 31744  }
   0xe   : > { %2305 = vmatprep.subr.bf16.mxu0 %v2682_v1  ;;  %2323 = vmatprep.mubr.msk.bf16.mxu1 %vm2683_vm0, %v2682_v1  ;;  %v395_v7 = vpack.c.bf16 %v394_v5, %v394_v5  ;;  %v2798_v8 = vld [vmem:[%s3336_s4] ss:$0 sm:$0xff]  ;;  %v2854_v34 = vld [vmem:[%s3336_s4 + $0x1] ss:$0 sm:$0xff]  ;;  %v2527_v62 = vld [vmem:[%s3337_s5 + $0x8] sm:$0xff]   ;;  %s2932_s30 = scalar_lea.vmem %s3332_s0, %s2926_s25  ;;  %s374_s14 = scalar_lea.vmem %s3333_s1, %s2926_s25  ;;  %vm2026_vm14 = vcmask 7168  }
   0xf   : > { %2316 = vmatpush3.bf16.msra.mxu1 %v2809_v24  ;;  %v2831_v28 = vld [vmem:[%s3335_s3 + $0x20] sm:$0xff]   ;;  %s378_s22 = scalar_lea.vmem %s3341_s9, %s2926_s25  ;;  %s382_s23 = scalar_lea.vmem %s3342_s10, %s2926_s25 }
  0x10   : > { %2317 = vmatprep.subr.bf16.mxu1 %v2682_v1 }
  0x11   : > { %2306 = vmatpush3.bf16.msra.mxu0 %v2765_v2 }
  0x12   : > { %2307 = vmatprep.subr.bf16.mxu0 %v2682_v1 }
  0x13   : > { %2318 = vmatpush3.bf16.msra.mxu1 %v2815_v25 }
  0x14   : > { %2319 = vmatprep.subr.bf16.mxu1 %v2682_v1 }
  0x15   : > { %2308 = vmatpush3.bf16.msra.mxu0 %v2778_v4 }
  0x16   : > { %2309 = vmatprep.subr.bf16.mxu0 %v2682_v1 }
  0x17   : > { %2320 = vmatpush3.bf16.msra.mxu1 %v2822_v26 }
  0x18   : > { %2321 = vmatprep.subr.bf16.mxu1 %v2682_v1 }
  0x19   : > { %2310 = vmatpush3.bf16.msra.mxu0 %v2786_v6 }
  0x1a   : > { %2327 = vmatprep.subr.bf16.mxu0 %v2682_v1 }
  0x1b   : > { %2322 = vmatpush3.bf16.msra.mxu1 %v2831_v28 }
  0x1c   : > { %2312 = vmatmul.mubr.msk.bf16.vlgmr.msra.gmra.mxu0 %vm435_vm2, %v395_v7  ;;  %2335 = vmatprep.subr.bf16.mxu1 %v2682_v1 }
  0x1d   : > { %2331 = vmatprep.mubr.msk.bf16.mxu0 %vm2683_vm0, %v2682_v1  ;;  %2328 = vmatpush3.bf16.msra.mxu0 %v2527_v62 }
  0x1e   : > { %2329 = vmatprep.subr.bf16.mxu0 %v2682_v1 }
  0xdc   : > { %v473_v9 = vpop.f32.mrf.mxu0 }
  0xdd   : > { %v474_v10 = vadd.f32 %v2798_v8, %v473_v9  ;;  %v2528_v9 = vld [vmem:[%s3337_s5] sm:$0xff]  }
  0xde   : > { %v2313_v11 = vpop.f32.mrf.mxu0  ;;  %2330 = vmatpush3.bf16.msra.mxu0 %v2528_v9 }
  0xdf   : > { %2539 = vtanh.f32 %v474_v10  ;;  %v2141_v15 = vmul.f32 -1.442695, %v474_v10  ;;  %2347 = vmatprep.subr.bf16.mxu0 %v2682_v1 }
  0xe0   : > { %v476_v12 = vpop.f32.mrf.mxu0 }
  0xe1   : > { %2541 = vpow2.f32 %v2141_v15 }
  0xe2   : > { %v2314_v13 = vpop.f32.mrf.mxu0 }
  0xec   : > { %v2540_v14 = vpop.eup %2539 }
  0xed   : > { %488 = vrot.lane.b32.xlu0 %v2540_v14, %s2684_s27 }
  0xee   : > { %v2542_v16 = vpop.eup %2541 }
  0xef   : > { %v482_v17 = vadd.f32 1.0, %v2542_v16 }
  0xf1   : > { %2543 = vrcp.f32 %v482_v17 }
  0xfe   : > { %v2544_v18 = vpop.eup %2543 }
  0xff   : > { %v486_v21 = vmul.f32 0.0, %v2544_v18 }
 0x15f   : > { %v489_v19 = vpop.permute.xlu0 %488 }
 0x160   : > { %v491_v20 = vmul.f32 %v2544_v18, %v489_v19 }
 0x162   : > { %493 = vrot.lane.b32.xlu0 %v491_v20, %s2685_s28 }
 0x1d4   : > { %v494_v22 = vpop.permute.xlu0 %493 }
 0x1d5   : > { %v2803_v23 = vadd.f32 %v494_v22, %v486_v21 }
 0x1d7   : > { %2545 = vtanh.f32 %v2803_v23 }
 0x1e4   : > { %v2546_v27 = vpop.eup %2545 }
 0x1e5   : > { %499 = vrot.lane.b32.xlu1 %v2546_v27, %s2684_s27 }
 0x257   : > { %v500_v29 = vpop.permute.xlu1 %499 }
 0x258   : > { %v2835_v30 = vmul.f32 %v2544_v18, %v500_v29 }
 0x25a   : > { %504 = vrot.lane.b32.xlu1 %v2835_v30, %s2685_s28 }
 0x2cc   : > { %v505_v31 = vpop.permute.xlu1 %504 }
 0x2cd   : > { %v507_v32 = vsel %vm393_vm1, %v505_v31, 0.0 }
 0x2ce   : > { %v508_v33 = vpack.c.bf16 %v507_v32, %v507_v32 }
 0x2d0   : > { %2324 = vmatmul.mubr.msk.bf16.vlgmr.msra.gmra.mxu1 %vm435_vm2, %v508_v33 }
 0x2d1   : > { %2336 = vmatpush3.bf16.msra.mxu1 %v2757_v0  ;;  %2343 = vmatprep.mubr.msk.bf16.mxu1 %vm2683_vm0, %v2682_v1 }
 0x2d2   : > { %2337 = vmatprep.subr.bf16.mxu1 %v2682_v1 }
 0x2d5   : > { %2338 = vmatpush3.bf16.msra.mxu1 %v2765_v2 }
 0x2d6   : > { %2339 = vmatprep.subr.bf16.mxu1 %v2682_v1 }
 0x2d9   : > { %2340 = vmatpush3.bf16.msra.mxu1 %v2778_v4 }
 0x2da   : > { %2341 = vmatprep.subr.bf16.mxu1 %v2682_v1 }
 0x2dd   : > { %2342 = vmatpush3.bf16.msra.mxu1 %v2786_v6 }
 0x2de   : > { %2359 = vmatprep.subr.bf16.mxu1 %v2682_v1 }
 0x390   : > { %v587_v35 = vpop.f32.mrf.mxu1 }
 0x391   : > { %v588_v36 = vadd.f32 %v2854_v34, %v587_v35 }
 0x392   : > { %v2325_v37 = vpop.f32.mrf.mxu1 }
 0x393   : > { %2547 = vtanh.f32 %v588_v36  ;;  %v2157_v41 = vmul.f32 -1.442695, %v588_v36  ;;  %v2686_v36 = vmov 0  }
 0x394   : > { %v590_v38 = vpop.f32.mrf.mxu1  ;;  %2512 = vset.pattern.permute.xlu1 %v2686_v36 }
 0x395   : > { %2549 = vpow2.f32 %v2157_v41 }
 0x396   : > { %v2326_v39 = vpop.f32.mrf.mxu1 }
 0x3a0   : > { %v2548_v40 = vpop.eup %2547 }
 0x3a1   : > { %602 = vrot.lane.b32.xlu0 %v2548_v40, %s2684_s27 }
 0x3a2   : > { %v2550_v42 = vpop.eup %2549 }
 0x3a3   : > { %v596_v43 = vadd.f32 1.0, %v2550_v42  ;;  %v2935_v42 = vld [vmem:[%s2932_s30] sm:$0xff] }
 0x3a4   : > { %vm969_vm3 = vcmp.eq.s32.totalorder %v2935_v42, 1 }
 0x3a5   : > { %2551 = vrcp.f32 %v596_v43 }
 0x3b2   : > { %v2552_v44 = vpop.eup %2551 }
 0x3b3   : > { %v600_v47 = vmul.f32 0.0, %v2552_v44 }
 0x413   : > { %v603_v45 = vpop.permute.xlu0 %602 }
 0x414   : > { %v605_v46 = vmul.f32 %v2552_v44, %v603_v45 }
 0x416   : > { %607 = vrot.lane.b32.xlu1 %v605_v46, %s2685_s28 }
 0x488   : > { %v608_v48 = vpop.permute.xlu1 %607 }
 0x489   : > { %v2859_v49 = vadd.f32 %v608_v48, %v600_v47 }
 0x48b   : > { %2553 = vtanh.f32 %v2859_v49 }
 0x498   : > { %v2554_v50 = vpop.eup %2553 }
 0x499   : > { %613 = vrot.lane.b32.xlu0 %v2554_v50, %s2684_s27 }
 0x49d   : > { %722 = vrot.lane.b32.xlu0 %v2835_v30, %s2684_s27 }
 0x50b   : > { %v614_v51 = vpop.permute.xlu0 %613 }
 0x50c   : > { %v2865_v52 = vmul.f32 %v2552_v44, %v614_v51  ;;  %v2942_v44 = vsel %vm969_vm3, 1, %v2686_v36 }
 0x50e   : > { %719 = vrot.lane.b32.xlu1 %v2865_v52, %s2685_s28  ;;  %v617_v13 = vpack.c.bf16 %v2865_v52, %v2865_v52 }
 0x50f   : > { %v723_v53 = vpop.permute.xlu0 %722 }
 0x580   : > { %v720_v54 = vpop.permute.xlu1 %719 }
 0x581   : > { %v725_v55 = vsel %vm393_vm1, %v720_v54, %v723_v53 }
 0x582   : > { %v726_v56 = vpack.c.bf16 %v725_v55, %v725_v55 }
 0x584   : > { %2344 = vmatmul.mubr.msk.bf16.vlgmr.msra.gmra.mxu1 %vm435_vm2, %v726_v56 }
 0x585   : > { %2363 = vmatprep.mubr.msk.bf16.mxu1 %vm2683_vm0, %v2682_v1 }
 0x644   : > { %v764_v57 = vpop.f32.mrf.mxu1 }
 0x645   : > { %v765_v58 = vadd.f32 %v2798_v8, %v764_v57 }
 0x646   : > { %v2345_v59 = vpop.f32.mrf.mxu1 }
 0x647   : > { %2555 = vtanh.f32 %v765_v58  ;;  %v2163_v3 = vmul.f32 -1.442695, %v765_v58 }
 0x648   : > { %v767_v60 = vpop.f32.mrf.mxu1 }
 0x649   : > { %2557 = vpow2.f32 %v2163_v3 }
 0x64a   : > { %v2346_v61 = vpop.f32.mrf.mxu1 }
 0x654   : > { %v2556_v63 = vpop.eup %2555 }
 0x655   : > { %779 = vrot.lane.b32.xlu1 %v2556_v63, %s2684_s27 }
 0x656   : > { %v2558_v5 = vpop.eup %2557 }
 0x657   : > { %v773_v7 = vadd.f32 1.0, %v2558_v5 }
 0x659   : > { %2559 = vrcp.f32 %v773_v7 }
 0x666   : > { %v2560_v10 = vpop.eup %2559 }
 0x667   : > { %v777_v14 = vmul.f32 %v2560_v10, %v2803_v23 }
 0x6c7   : > { %v780_v11 = vpop.permute.xlu1 %779 }
 0x6c8   : > { %v782_v12 = vmul.f32 %v2560_v10, %v780_v11 }
 0x6ca   : > { %784 = vrot.lane.b32.xlu0 %v782_v12, %s2685_s28 }
 0x6ce   : > { %630 = vrot.lane.b32.xlu0 %v617_v13, %s2685_s28 }
 0x6d2   : > { %798 = vrot.lane.b32.xlu0 %v2865_v52, %s2684_s27 }
 0x73c   : > { %v785_v15 = vpop.permute.xlu0 %784 }
 0x73d   : > { %v2890_v16 = vadd.f32 %v785_v15, %v777_v14 }
 0x73f   : > { %2561 = vtanh.f32 %v2890_v16 }
 0x740   : > { %v631_v17 = vpop.permute.xlu0 %630 }
 0x741   : > { %2332 = vmatmul.mubr.msk.bf16.vlgmr.msra.gmra.mxu0 %vm393_vm1, %v631_v17  ;;  %v2530_v17 = vld [vmem:[%s3339_s7] sm:$0xff]  }
 0x742   : > { %2348 = vmatpush3.bf16.msra.mxu0 %v2809_v24  ;;  %2355 = vmatprep.mubr.msk.bf16.mxu0 %vm2683_vm0, %v2682_v1 }
 0x743   : > { %2349 = vmatprep.subr.bf16.mxu0 %v2682_v1 }
 0x744   : > { %v799_v31 = vpop.permute.xlu0 %798 }
 0x746   : > { %2350 = vmatpush3.bf16.msra.mxu0 %v2815_v25 }
 0x747   : > { %2351 = vmatprep.subr.bf16.mxu0 %v2682_v1 }
 0x74a   : > { %2352 = vmatpush3.bf16.msra.mxu0 %v2822_v26 }
 0x74b   : > { %2353 = vmatprep.subr.bf16.mxu0 %v2682_v1 }
 0x74c   : > { %v2562_v18 = vpop.eup %2561 }
 0x74d   : > { %790 = vrot.lane.b32.xlu1 %v2562_v18, %s2684_s27 }
 0x74e   : > { %2354 = vmatpush3.bf16.msra.mxu0 %v2831_v28 }
 0x74f   : > { %2367 = vmatprep.subr.bf16.mxu0 %v2682_v1 }
 0x7bf   : > { %v791_v19 = vpop.permute.xlu1 %790 }
 0x7c0   : > { %v793_v20 = vmul.f32 %v2560_v10, %v791_v19 }
 0x7c2   : > { %795 = vrot.lane.b32.xlu1 %v793_v20, %s2685_s28 }
 0x801   : > { %v2906_v21 = vpop.f32.mrf.mxu0 }
 0x803   : > { %v2333_v22 = vpop.f32.mrf.mxu0 }
 0x805   : > { %v684_v27 = vpop.f32.mrf.mxu0 }
 0x807   : > { %v2334_v29 = vpop.f32.mrf.mxu0 }
 0x834   : > { %v796_v32 = vpop.permute.xlu1 %795 }
 0x835   : > { %v801_v33 = vsel %vm393_vm1, %v796_v32, %v799_v31 }
 0x836   : > { %v802_v35 = vpack.c.bf16 %v801_v33, %v801_v33 }
 0x838   : > { %2356 = vmatmul.mubr.msk.bf16.vlgmr.msra.gmra.mxu0 %vm435_vm2, %v802_v35 }
 0x839   : > { %2368 = vmatpush3.bf16.msra.mxu0 %v2757_v0  ;;  %2375 = vmatprep.mubr.msk.bf16.mxu0 %vm2683_vm0, %v2682_v1 }
 0x83a   : > { %2369 = vmatprep.subr.bf16.mxu0 %v2682_v1 }
 0x83d   : > { %2370 = vmatpush3.bf16.msra.mxu0 %v2765_v2 }
 0x83e   : > { %2371 = vmatprep.subr.bf16.mxu0 %v2682_v1 }
 0x841   : > { %2372 = vmatpush3.bf16.msra.mxu0 %v2778_v4 }
 0x842   : > { %2373 = vmatprep.subr.bf16.mxu0 %v2682_v1 }
 0x845   : > { %2374 = vmatpush3.bf16.msra.mxu0 %v2786_v6 }
 0x846   : > { %2391 = vmatprep.subr.bf16.mxu0 %v2682_v1 }
 0x8f8   : > { %v840_v37 = vpop.f32.mrf.mxu0 }
 0x8f9   : > { %v841_v38 = vadd.f32 %v2854_v34, %v840_v37 }
 0x8fa   : > { %v2357_v39 = vpop.f32.mrf.mxu0 }
 0x8fb   : > { %2563 = vtanh.f32 %v841_v38  ;;  %v2165_v45 = vmul.f32 -1.442695, %v841_v38 }
 0x8fc   : > { %v843_v40 = vpop.f32.mrf.mxu0 }
 0x8fd   : > { %2565 = vpow2.f32 %v2165_v45 }
 0x8fe   : > { %v2358_v41 = vpop.f32.mrf.mxu0 }
 0x908   : > { %v2564_v43 = vpop.eup %2563 }
 0x909   : > { %855 = vrot.lane.b32.xlu1 %v2564_v43, %s2684_s27 }
 0x90a   : > { %v2566_v46 = vpop.eup %2565 }
 0x90b   : > { %v849_v47 = vadd.f32 1.0, %v2566_v46 }
 0x90d   : > { %977 = vperm.xlu1 %2512, %v2942_v44   ;;  %2567 = vrcp.f32 %v849_v47 }
 0x91a   : > { %v2568_v48 = vpop.eup %2567 }
 0x91b   : > { %v853_v53 = vmul.f32 %v2568_v48, %v2859_v49 }
 0x97b   : > { %v856_v50 = vpop.permute.xlu1 %855 }
 0x97c   : > { %v858_v51 = vmul.f32 %v2568_v48, %v856_v50 }
 0x97e   : > { %860 = vrot.lane.b32.xlu0 %v858_v51, %s2685_s28 }
 0x988   : > { %v2950_v56 = vpop.permute.xlu1 %977 }
 0x989   : > { %vm979_vm4 = vcmp.eq.s32.totalorder %v2950_v56, 1 }
 0x98a   : > { %v981_v58 = vsel %vm979_vm4, %v793_v20, %v2835_v30  ;;  %v982_v27 = vsel %vm979_vm4, %v2890_v16, %v2803_v23 }
 0x9f0   : > { %v861_v54 = vpop.permute.xlu0 %860 }
 0x9f1   : > { %v2947_v55 = vadd.f32 %v861_v54, %v853_v53 }
 0x9f3   : > { %2569 = vtanh.f32 %v2947_v55 }
 0xa00   : > { %v2570_v57 = vpop.eup %2569 }
 0xa01   : > { %866 = vrot.lane.b32.xlu0 %v2570_v57, %s2684_s27 }
 0xa05   : > { %989 = vrot.lane.b32.xlu0 %v981_v58, %s2684_s27 }
 0xa73   : > { %v867_v59 = vpop.permute.xlu0 %866 }
 0xa74   : > { %v869_v60 = vmul.f32 %v2568_v48, %v867_v59 }
 0xa76   : > { %v980_v61 = vsel %vm979_vm4, %v869_v60, %v2865_v52  ;;  %v2529_v52 = vld [vmem:[%s3339_s7 + $0x8] sm:$0xff]   ;;  %v870_v22 = vpack.c.bf16 %v869_v60, %v869_v60 }
 0xa77   : > { %985 = vrot.lane.b32.xlu1 %v980_v61, %s2685_s28  ;;  %v990_v62 = vpop.permute.xlu0 %989  ;;  %2360 = vmatpush3.bf16.msra.mxu1 %v2529_v52 }
 0xa78   : > { %2361 = vmatprep.subr.bf16.mxu1 %v2682_v1 }
 0xa7b   : > { %2362 = vmatpush3.bf16.msra.mxu1 %v2530_v17  ;;  %v2531_v17 = vld [vmem:[%s3337_s5 + $0x18] sm:$0xff]  }
 0xa7c   : > { %2379 = vmatprep.subr.bf16.mxu1 %v2682_v1 }
 0xae9   : > { %v986_v63 = vpop.permute.xlu1 %985 }
 0xaea   : > { %v992_v3 = vsel %vm393_vm1, %v986_v63, %v990_v62  ;;  %v983_v63 = vsel %vm979_vm4, %v2947_v55, %v2859_v49 }
 0xaeb   : > { %v993_v5 = vpack.c.bf16 %v992_v3, %v992_v3 }
 0xaed   : > { %2376 = vmatmul.mubr.msk.bf16.vlgmr.msra.gmra.mxu0 %vm435_vm2, %v993_v5 }
 0xaee   : > { %2395 = vmatprep.mubr.msk.bf16.mxu0 %vm2683_vm0, %v2682_v1  ;;  %2392 = vmatpush3.bf16.msra.mxu0 %v2531_v17 }
 0xaef   : > { %2393 = vmatprep.subr.bf16.mxu0 %v2682_v1 }
 0xbad   : > { %v1031_v30 = vpop.f32.mrf.mxu0 }
 0xbae   : > { %v1032_v7 = vadd.f32 %v2798_v8, %v1031_v30 }
 0xbaf   : > { %v2377_v9 = vpop.f32.mrf.mxu0 }
 0xbb0   : > { %2571 = vtanh.f32 %v1032_v7  ;;  %v2172_v13 = vmul.f32 -1.442695, %v1032_v7 }
 0xbb1   : > { %v1034_v10 = vpop.f32.mrf.mxu0 }
 0xbb2   : > { %2573 = vpow2.f32 %v2172_v13 }
 0xbb3   : > { %v2378_v11 = vpop.f32.mrf.mxu0 }
 0xbbd   : > { %v2572_v12 = vpop.eup %2571 }
 0xbbe   : > { %1046 = vrot.lane.b32.xlu1 %v2572_v12, %s2684_s27 }
 0xbbf   : > { %v2574_v14 = vpop.eup %2573 }
 0xbc0   : > { %v1040_v15 = vadd.f32 1.0, %v2574_v14 }
 0xbc2   : > { %2575 = vrcp.f32 %v1040_v15 }
 0xbcf   : > { %v2576_v18 = vpop.eup %2575 }
 0xbd0   : > { %v1044_v29 = vmul.f32 %v2576_v18, %v982_v27  ;;  %v2532_v27 = vld [vmem:[%s3337_s5 + $0x10] sm:$0xff]  }
 0xbd1   : > { %2394 = vmatpush3.bf16.msra.mxu0 %v2532_v27 }
 0xbd2   : > { %2411 = vmatprep.subr.bf16.mxu0 %v2682_v1 }
 0xc30   : > { %v1047_v19 = vpop.permute.xlu1 %1046 }
 0xc31   : > { %v1049_v20 = vmul.f32 %v2576_v18, %v1047_v19 }
 0xc33   : > { %1051 = vrot.lane.b32.xlu0 %v1049_v20, %s2685_s28 }
 0xc37   : > { %883 = vrot.lane.b32.xlu0 %v870_v22, %s2685_s28 }
 0xc3b   : > { %1065 = vrot.lane.b32.xlu0 %v980_v61, %s2684_s27 }
 0xca5   : > { %v1052_v31 = vpop.permute.xlu0 %1051 }
 0xca6   : > { %v2983_v32 = vadd.f32 %v1052_v31, %v1044_v29 }
 0xca8   : > { %2577 = vtanh.f32 %v2983_v32 }
 0xca9   : > { %v884_v33 = vpop.permute.xlu0 %883 }
 0xcaa   : > { %2364 = vmatmul.mubr.msk.bf16.vlgmr.msra.gmra.mxu1 %vm393_vm1, %v884_v33 }
 0xcab   : > { %2380 = vmatpush3.bf16.msra.mxu1 %v2809_v24  ;;  %2387 = vmatprep.mubr.msk.bf16.mxu1 %vm2683_vm0, %v2682_v1 }
 0xcac   : > { %2381 = vmatprep.subr.bf16.mxu1 %v2682_v1 }
 0xcad   : > { %v1066_v41 = vpop.permute.xlu0 %1065 }
 0xcaf   : > { %2382 = vmatpush3.bf16.msra.mxu1 %v2815_v25 }
 0xcb0   : > { %2383 = vmatprep.subr.bf16.mxu1 %v2682_v1 }
 0xcb3   : > { %2384 = vmatpush3.bf16.msra.mxu1 %v2822_v26 }
 0xcb4   : > { %2385 = vmatprep.subr.bf16.mxu1 %v2682_v1 }
 0xcb5   : > { %v2578_v23 = vpop.eup %2577 }
 0xcb6   : > { %1057 = vrot.lane.b32.xlu1 %v2578_v23, %s2684_s27 }
 0xcb7   : > { %2386 = vmatpush3.bf16.msra.mxu1 %v2831_v28 }
 0xcb8   : > { %2399 = vmatprep.subr.bf16.mxu1 %v2682_v1 }
 0xd28   : > { %v1058_v16 = vpop.permute.xlu1 %1057 }
 0xd29   : > { %v2998_v35 = vmul.f32 %v2576_v18, %v1058_v16 }
 0xd2b   : > { %1062 = vrot.lane.b32.xlu1 %v2998_v35, %s2685_s28 }
 0xd6a   : > { %v3002_v37 = vpop.f32.mrf.mxu1 }
 0xd6c   : > { %v2365_v38 = vpop.f32.mrf.mxu1 }
 0xd6e   : > { %v937_v39 = vpop.f32.mrf.mxu1 }
 0xd70   : > { %v2366_v40 = vpop.f32.mrf.mxu1 }
 0xd9d   : > { %v1063_v43 = vpop.permute.xlu1 %1062 }
 0xd9e   : > { %v1068_v45 = vsel %vm393_vm1, %v1063_v43, %v1066_v41 }
 0xd9f   : > { %v1069_v46 = vpack.c.bf16 %v1068_v45, %v1068_v45 }
 0xda1   : > { %2388 = vmatmul.mubr.msk.bf16.vlgmr.msra.gmra.mxu1 %vm435_vm2, %v1069_v46 }
 0xda2   : > { %2400 = vmatpush3.bf16.msra.mxu1 %v2757_v0  ;;  %2407 = vmatprep.mubr.msk.bf16.mxu1 %vm2683_vm0, %v2682_v1 }
 0xda3   : > { %2401 = vmatprep.subr.bf16.mxu1 %v2682_v1 }
 0xda6   : > { %2402 = vmatpush3.bf16.msra.mxu1 %v2765_v2 }
 0xda7   : > { %2403 = vmatprep.subr.bf16.mxu1 %v2682_v1 }
 0xdaa   : > { %2404 = vmatpush3.bf16.msra.mxu1 %v2778_v4 }
 0xdab   : > { %2405 = vmatprep.subr.bf16.mxu1 %v2682_v1 }
 0xdae   : > { %2406 = vmatpush3.bf16.msra.mxu1 %v2786_v6 }
 0xdaf   : > { %2423 = vmatprep.subr.bf16.mxu1 %v2682_v1 }
 0xe61   : > { %v1107_v47 = vpop.f32.mrf.mxu1 }
 0xe62   : > { %v1108_v48 = vadd.f32 %v2854_v34, %v1107_v47 }
 0xe63   : > { %v2389_v50 = vpop.f32.mrf.mxu1 }
 0xe64   : > { %2579 = vtanh.f32 %v1108_v48  ;;  %v2174_v57 = vmul.f32 -1.442695, %v1108_v48 }
 0xe65   : > { %v1110_v51 = vpop.f32.mrf.mxu1 }
 0xe66   : > { %2581 = vpow2.f32 %v2174_v57 }
 0xe67   : > { %v2390_v53 = vpop.f32.mrf.mxu1 }
 0xe71   : > { %v2580_v54 = vpop.eup %2579 }
 0xe72   : > { %1122 = vrot.lane.b32.xlu1 %v2580_v54, %s2684_s27 }
 0xe73   : > { %v2582_v58 = vpop.eup %2581 }
 0xe74   : > { %v1116_v59 = vadd.f32 1.0, %v2582_v58  ;;  %v2687_v58 = vmov 1  }
 0xe75   : > { %2513 = vset.pattern.permute.xlu0 %v2687_v58 }
 0xe76   : > { %2583 = vrcp.f32 %v1116_v59 }
 0xe83   : > { %v2584_v60 = vpop.eup %2583 }
 0xe84   : > { %v1120_v3 = vmul.f32 %v2584_v60, %v983_v63 }
 0xee4   : > { %v1123_v61 = vpop.permute.xlu1 %1122 }
 0xee5   : > { %v1125_v62 = vmul.f32 %v2584_v60, %v1123_v61 }
 0xee7   : > { %1127 = vrot.lane.b32.xlu0 %v1125_v62, %s2685_s28 }
 0xf59   : > { %v1128_v5 = vpop.permute.xlu0 %1127 }
 0xf5a   : > { %v3023_v30 = vadd.f32 %v1128_v5, %v1120_v3 }
 0xf5c   : > { %2585 = vtanh.f32 %v3023_v30 }
 0xf69   : > { %v2586_v7 = vpop.eup %2585 }
 0xf6a   : > { %1133 = vrot.lane.b32.xlu1 %v2586_v7, %s2684_s27 }
 0xf6e   : > { %1242 = vrot.lane.b32.xlu1 %v2998_v35, %s2684_s27 }
 0xfdc   : > { %v1134_v9 = vpop.permute.xlu1 %1133 }
 0xfdd   : > { %v3029_v10 = vmul.f32 %v2584_v60, %v1134_v9 }
 0xfdf   : > { %1239 = vrot.lane.b32.xlu0 %v3029_v10, %s2685_s28  ;;  %v1137_v23 = vpack.c.bf16 %v3029_v10, %v3029_v10 }
 0xfe0   : > { %v1243_v56 = vpop.permute.xlu1 %1242 }
0x1051   : > { %v1240_v49 = vpop.permute.xlu0 %1239 }
0x1052   : > { %v1245_v55 = vsel %vm393_vm1, %v1240_v49, %v1243_v56 }
0x1053   : > { %v1246_v11 = vpack.c.bf16 %v1245_v55, %v1245_v55 }
0x1055   : > { %2408 = vmatmul.mubr.msk.bf16.vlgmr.msra.gmra.mxu1 %vm435_vm2, %v1246_v11 }
0x1056   : > { %2427 = vmatprep.mubr.msk.bf16.mxu1 %vm2683_vm0, %v2682_v1 }
0x1115   : > { %v1284_v52 = vpop.f32.mrf.mxu1 }
0x1116   : > { %v1285_v12 = vadd.f32 %v2798_v8, %v1284_v52 }
0x1117   : > { %v2409_v13 = vpop.f32.mrf.mxu1 }
0x1118   : > { %2587 = vtanh.f32 %v1285_v12  ;;  %v2185_v19 = vmul.f32 -1.442695, %v1285_v12 }
0x1119   : > { %v1287_v14 = vpop.f32.mrf.mxu1 }
0x111a   : > { %2589 = vpow2.f32 %v2185_v19 }
0x111b   : > { %v2410_v15 = vpop.f32.mrf.mxu1 }
0x1125   : > { %v2588_v18 = vpop.eup %2587 }
0x1126   : > { %1299 = vrot.lane.b32.xlu0 %v2588_v18, %s2684_s27 }
0x1127   : > { %v2590_v20 = vpop.eup %2589 }
0x1128   : > { %v1293_v22 = vadd.f32 1.0, %v2590_v20 }
0x112a   : > { %2591 = vrcp.f32 %v1293_v22 }
0x1137   : > { %v2592_v29 = vpop.eup %2591 }
0x1138   : > { %v1297_v16 = vmul.f32 %v2592_v29, %v2983_v32 }
0x1198   : > { %v1300_v31 = vpop.permute.xlu0 %1299 }
0x1199   : > { %v1302_v33 = vmul.f32 %v2592_v29, %v1300_v31 }
0x119b   : > { %1304 = vrot.lane.b32.xlu1 %v1302_v33, %s2685_s28 }
0x119f   : > { %1152 = vrot.lane.b32.xlu1 %v1137_v23, %s2685_s28 }
0x11a3   : > { %1318 = vrot.lane.b32.xlu1 %v3029_v10, %s2684_s27 }
0x120d   : > { %v1305_v38 = vpop.permute.xlu1 %1304 }
0x120e   : > { %v3054_v39 = vadd.f32 %v1305_v38, %v1297_v16  ;;  %v2534_v38 = vld [vmem:[%s3339_s7 + $0x10] sm:$0xff]  }
0x1210   : > { %2593 = vtanh.f32 %v3054_v39 }
0x1211   : > { %v1153_v40 = vpop.permute.xlu1 %1152 }
0x1212   : > { %2396 = vmatmul.mubr.msk.bf16.vlgmr.msra.gmra.mxu0 %vm393_vm1, %v1153_v40 }
0x1213   : > { %2412 = vmatpush3.bf16.msra.mxu0 %v2809_v24  ;;  %2419 = vmatprep.mubr.msk.bf16.mxu0 %vm2683_vm0, %v2682_v1 }
0x1214   : > { %2413 = vmatprep.subr.bf16.mxu0 %v2682_v1 }
0x1215   : > { %v1319_v51 = vpop.permute.xlu1 %1318 }
0x1217   : > { %2414 = vmatpush3.bf16.msra.mxu0 %v2815_v25 }
0x1218   : > { %2415 = vmatprep.subr.bf16.mxu0 %v2682_v1 }
0x121b   : > { %2416 = vmatpush3.bf16.msra.mxu0 %v2822_v26 }
0x121c   : > { %2417 = vmatprep.subr.bf16.mxu0 %v2682_v1 }
0x121d   : > { %v2594_v41 = vpop.eup %2593 }
0x121e   : > { %1310 = vrot.lane.b32.xlu0 %v2594_v41, %s2684_s27 }
0x121f   : > { %2418 = vmatpush3.bf16.msra.mxu0 %v2831_v28 }
0x1220   : > { %2431 = vmatprep.subr.bf16.mxu0 %v2682_v1 }
0x1290   : > { %v1311_v43 = vpop.permute.xlu0 %1310 }
0x1291   : > { %v1313_v45 = vmul.f32 %v2592_v29, %v1311_v43 }
0x1293   : > { %1315 = vrot.lane.b32.xlu0 %v1313_v45, %s2685_s28 }
0x12d2   : > { %v3070_v46 = vpop.f32.mrf.mxu0 }
0x12d4   : > { %v2397_v47 = vpop.f32.mrf.mxu0 }
0x12d6   : > { %v1206_v48 = vpop.f32.mrf.mxu0 }
0x12d8   : > { %v2398_v50 = vpop.f32.mrf.mxu0 }
0x1305   : > { %v1316_v53 = vpop.permute.xlu0 %1315 }
0x1306   : > { %v1321_v54 = vsel %vm393_vm1, %v1316_v53, %v1319_v51 }
0x1307   : > { %v1322_v57 = vpack.c.bf16 %v1321_v54, %v1321_v54 }
0x1309   : > { %2420 = vmatmul.mubr.msk.bf16.vlgmr.msra.gmra.mxu0 %vm435_vm2, %v1322_v57 }
0x130a   : > { %2432 = vmatpush3.bf16.msra.mxu0 %v2757_v0  ;;  %2439 = vmatprep.mubr.msk.bf16.mxu0 %vm2683_vm0, %v2682_v1 }
0x130b   : > { %2433 = vmatprep.subr.bf16.mxu0 %v2682_v1 }
0x130e   : > { %2434 = vmatpush3.bf16.msra.mxu0 %v2765_v2 }
0x130f   : > { %2435 = vmatprep.subr.bf16.mxu0 %v2682_v1 }
0x1312   : > { %2436 = vmatpush3.bf16.msra.mxu0 %v2778_v4 }
0x1313   : > { %2437 = vmatprep.subr.bf16.mxu0 %v2682_v1 }
0x1316   : > { %2438 = vmatpush3.bf16.msra.mxu0 %v2786_v6 }
0x1317   : > { %2455 = vmatprep.subr.bf16.mxu0 %v2682_v1 }
0x13c9   : > { %v1360_v0 = vpop.f32.mrf.mxu0 }
0x13ca   : > { %v1361_v59 = vadd.f32 %v2854_v34, %v1360_v0 }
0x13cb   : > { %v2421_v60 = vpop.f32.mrf.mxu0 }
0x13cc   : > { %2595 = vtanh.f32 %v1361_v59  ;;  %v2187_v63 = vmul.f32 -1.442695, %v1361_v59 }
0x13cd   : > { %v1363_v61 = vpop.f32.mrf.mxu0 }
0x13ce   : > { %2597 = vpow2.f32 %v2187_v63 }
0x13cf   : > { %v2422_v2 = vpop.f32.mrf.mxu0 }
0x13d9   : > { %v2596_v62 = vpop.eup %2595 }
0x13da   : > { %1375 = vrot.lane.b32.xlu0 %v2596_v62, %s2684_s27 }
0x13db   : > { %v2598_v3 = vpop.eup %2597 }
0x13dc   : > { %v1369_v5 = vadd.f32 1.0, %v2598_v3  ;;  %v2671_v3 = vld [vmem:[%s3335_s3 + $0x18] sm:$0xff]  }
0x13de   : > { %1502 = vperm.xlu0 %2513, %v2942_v44   ;;  %2599 = vrcp.f32 %v1369_v5  ;;  %v2672_v5 = vld [vmem:[%s3335_s3 + $0x10] sm:$0xff]  }
0x13e2   : > { %2514 = vset.pattern.permute.xlu0 %v2686_v36 }
0x13eb   : > { %v2600_v7 = vpop.eup %2599 }
0x13ec   : > { %v1373_v36 = vmul.f32 %v2600_v7, %v3023_v30 }
0x144c   : > { %v1376_v9 = vpop.permute.xlu0 %1375 }
0x144d   : > { %v1378_v56 = vmul.f32 %v2600_v7, %v1376_v9 }
0x144f   : > { %1380 = vrot.lane.b32.xlu1 %v1378_v56, %s2685_s28 }
0x1459   : > { %v3090_v49 = vpop.permute.xlu0 %1502 }
0x145a   : > { %vm1504_vm5 = vcmp.eq.s32.totalorder %v3090_v49, 1 }
0x145b   : > { %v1506_v44 = vsel %vm1504_vm5, %v1313_v45, %v2998_v35  ;;  %v1507_v47 = vsel %vm1504_vm5, %v3054_v39, %v2983_v32 }
0x145c   : > { %1514 = vrot.lane.b32.xlu0 %v1506_v44, %s2684_s27 }
0x14c1   : > { %v1381_v55 = vpop.permute.xlu1 %1380 }
0x14c2   : > { %v3098_v11 = vadd.f32 %v1381_v55, %v1373_v36 }
0x14c4   : > { %2601 = vtanh.f32 %v3098_v11 }
0x14ce   : > { %v1515_v35 = vpop.permute.xlu0 %1514 }
0x14d1   : > { %v2602_v52 = vpop.eup %2601 }
0x14d2   : > { %1386 = vrot.lane.b32.xlu1 %v2602_v52, %s2684_s27 }
0x1544   : > { %v1387_v12 = vpop.permute.xlu1 %1386 }
0x1545   : > { %v1389_v13 = vmul.f32 %v2600_v7, %v1387_v12 }
0x1547   : > { %v1505_v14 = vsel %vm1504_vm5, %v1389_v13, %v3029_v10  ;;  %v2533_v10 = vld [vmem:[%s3339_s7 + $0x18] sm:$0xff]   ;;  %v1390_v45 = vpack.c.bf16 %v1389_v13, %v1389_v13 }
0x1548   : > { %1510 = vrot.lane.b32.xlu1 %v1505_v14, %s2685_s28  ;;  %2424 = vmatpush3.bf16.msra.mxu1 %v2533_v10 }
0x1549   : > { %2425 = vmatprep.subr.bf16.mxu1 %v2682_v1 }
0x154c   : > { %2426 = vmatpush3.bf16.msra.mxu1 %v2534_v38 }
0x154d   : > { %2443 = vmatprep.subr.bf16.mxu1 %v2682_v1 }
0x15ba   : > { %v1511_v15 = vpop.permute.xlu1 %1510 }
0x15bb   : > { %v1517_v17 = vsel %vm393_vm1, %v1511_v15, %v1515_v35  ;;  %v1508_v35 = vsel %vm1504_vm5, %v3098_v11, %v3023_v30 }
0x15bc   : > { %v1518_v18 = vpack.c.bf16 %v1517_v17, %v1517_v17 }
0x15be   : > { %2440 = vmatmul.mubr.msk.bf16.vlgmr.msra.gmra.mxu0 %vm435_vm2, %v1518_v18 }
0x15bf   : > { %2459 = vmatprep.mubr.msk.bf16.mxu0 %vm2683_vm0, %v2682_v1 }
0x167e   : > { %v1556_v19 = vpop.f32.mrf.mxu0 }
0x167f   : > { %v1557_v20 = vadd.f32 %v2798_v8, %v1556_v19 }
0x1680   : > { %v2441_v22 = vpop.f32.mrf.mxu0 }
0x1681   : > { %2603 = vtanh.f32 %v1557_v20  ;;  %v2198_v33 = vmul.f32 -1.442695, %v1557_v20 }
0x1682   : > { %v1559_v27 = vpop.f32.mrf.mxu0 }
0x1683   : > { %2605 = vpow2.f32 %v2198_v33 }
0x1684   : > { %v2442_v29 = vpop.f32.mrf.mxu0 }
0x168e   : > { %v2604_v31 = vpop.eup %2603 }
0x168f   : > { %1571 = vrot.lane.b32.xlu1 %v2604_v31, %s2684_s27 }
0x1690   : > { %v2606_v23 = vpop.eup %2605 }
0x1691   : > { %v1565_v16 = vadd.f32 1.0, %v2606_v23 }
0x1693   : > { %2607 = vrcp.f32 %v1565_v16  ;;  %v2535_v16 = vld [vmem:[%s3337_s5 + $0x28] sm:$0xff]  }
0x1694   : > { %2456 = vmatpush3.bf16.msra.mxu0 %v2535_v16 }
0x1695   : > { %2457 = vmatprep.subr.bf16.mxu0 %v2682_v1 }
0x16a0   : > { %v2608_v40 = vpop.eup %2607 }
0x16a1   : > { %v1569_v48 = vmul.f32 %v2608_v40, %v1507_v47 }
0x1701   : > { %v1572_v41 = vpop.permute.xlu1 %1571 }
0x1702   : > { %v1574_v43 = vmul.f32 %v2608_v40, %v1572_v41 }
0x1704   : > { %1576 = vrot.lane.b32.xlu0 %v1574_v43, %s2685_s28 }
0x1708   : > { %1405 = vrot.lane.b32.xlu0 %v1390_v45, %s2685_s28 }
0x170c   : > { %1590 = vrot.lane.b32.xlu0 %v1505_v14, %s2684_s27 }
0x1776   : > { %v1577_v50 = vpop.permute.xlu0 %1576 }
0x1777   : > { %v3127_v51 = vadd.f32 %v1577_v50, %v1569_v48 }
0x1779   : > { %2609 = vtanh.f32 %v3127_v51 }
0x177a   : > { %v1406_v53 = vpop.permute.xlu0 %1405 }
0x177b   : > { %2428 = vmatmul.mubr.msk.bf16.vlgmr.msra.gmra.mxu1 %vm393_vm1, %v1406_v53 }
0x177c   : > { %2444 = vmatpush3.bf16.msra.mxu1 %v2809_v24  ;;  %2451 = vmatprep.mubr.msk.bf16.mxu1 %vm2683_vm0, %v2682_v1 }
0x177d   : > { %2445 = vmatprep.subr.bf16.mxu1 %v2682_v1 }
0x177e   : > { %v1591_v61 = vpop.permute.xlu0 %1590 }
0x1780   : > { %2446 = vmatpush3.bf16.msra.mxu1 %v2815_v25 }
0x1781   : > { %2447 = vmatprep.subr.bf16.mxu1 %v2682_v1 }
0x1784   : > { %2448 = vmatpush3.bf16.msra.mxu1 %v2822_v26 }
0x1785   : > { %2449 = vmatprep.subr.bf16.mxu1 %v2682_v1 }
0x1786   : > { %v2610_v32 = vpop.eup %2609 }
0x1787   : > { %1582 = vrot.lane.b32.xlu1 %v2610_v32, %s2684_s27 }
0x1788   : > { %2450 = vmatpush3.bf16.msra.mxu1 %v2831_v28 }
0x1789   : > { %2463 = vmatprep.subr.bf16.mxu1 %v2682_v1 }
0x17f9   : > { %v1583_v39 = vpop.permute.xlu1 %1582 }
0x17fa   : > { %v1585_v54 = vmul.f32 %v2608_v40, %v1583_v39 }
0x17fc   : > { %1587 = vrot.lane.b32.xlu1 %v1585_v54, %s2685_s28 }
0x183b   : > { %v3143_v57 = vpop.f32.mrf.mxu1 }
0x183d   : > { %v2429_v0 = vpop.f32.mrf.mxu1 }
0x183f   : > { %v1459_v59 = vpop.f32.mrf.mxu1 }
0x1841   : > { %v2430_v60 = vpop.f32.mrf.mxu1 }
0x186e   : > { %v1588_v2 = vpop.permute.xlu1 %1587 }
0x186f   : > { %v1593_v62 = vsel %vm393_vm1, %v1588_v2, %v1591_v61 }
0x1870   : > { %v1594_v63 = vpack.c.bf16 %v1593_v62, %v1593_v62 }
0x1872   : > { %2452 = vmatmul.mubr.msk.bf16.vlgmr.msra.gmra.mxu1 %vm435_vm2, %v1594_v63 }
0x1873   : > { %2464 = vmatpush3.bf16.msra.mxu1 %v2671_v3  ;;  %2471 = vmatprep.mubr.msk.bf16.mxu1 %vm2683_vm0, %v2682_v1 }
0x1874   : > { %2465 = vmatprep.subr.bf16.mxu1 %v2682_v1 }
0x1877   : > { %2466 = vmatpush3.bf16.msra.mxu1 %v2672_v5 }
0x1878   : > { %2467 = vmatprep.subr.bf16.mxu1 %v2682_v1 }
0x187b   : > { %2468 = vmatpush3.bf16.msra.mxu1 %v2778_v4 }
0x187c   : > { %2469 = vmatprep.subr.bf16.mxu1 %v2682_v1 }
0x187f   : > { %2470 = vmatpush3.bf16.msra.mxu1 %v2786_v6 }
0x1880   : > { %2487 = vmatprep.subr.bf16.mxu1 %v2682_v1 }
0x1932   : > { %v1632_v7 = vpop.f32.mrf.mxu1 }
0x1933   : > { %v1633_v9 = vadd.f32 %v2854_v34, %v1632_v7 }
0x1934   : > { %v2453_v56 = vpop.f32.mrf.mxu1 }
0x1935   : > { %2611 = vtanh.f32 %v1633_v9  ;;  %v2200_v52 = vmul.f32 -1.442695, %v1633_v9 }
0x1936   : > { %v1635_v44 = vpop.f32.mrf.mxu1 }
0x1937   : > { %2613 = vpow2.f32 %v2200_v52 }
0x1938   : > { %v2454_v36 = vpop.f32.mrf.mxu1 }
0x1942   : > { %v2612_v55 = vpop.eup %2611 }
0x1943   : > { %1647 = vrot.lane.b32.xlu1 %v2612_v55, %s2684_s27 }
0x1944   : > { %v2614_v12 = vpop.eup %2613 }
0x1945   : > { %v1641_v4 = vadd.f32 1.0, %v2614_v12 }
0x1947   : > { %2615 = vrcp.f32 %v1641_v4 }
0x1954   : > { %v2616_v13 = vpop.eup %2615 }
0x1955   : > { %v1645_v15 = vmul.f32 %v2616_v13, %v1508_v35  ;;  %v2158_v35 = vld [vmem:[%s3338_s6] ss:$0 sm:$0xff] }
0x19b5   : > { %v1648_v14 = vpop.permute.xlu1 %1647 }
0x19b6   : > { %v1650_v6 = vmul.f32 %v2616_v13, %v1648_v14 }
0x19b8   : > { %1652 = vrot.lane.b32.xlu0 %v1650_v6, %s2685_s28 }
0x1a2a   : > { %v1653_v17 = vpop.permute.xlu0 %1652 }
0x1a2b   : > { %v3168_v18 = vadd.f32 %v1653_v17, %v1645_v15  ;;  %v682_v15 = vadd.f32 %v2158_v35, %v2906_v21 }
0x1a2d   : > { %2617 = vtanh.f32 %v3168_v18  ;;  %v689_v17 = vsel %vm688_vm6, %v682_v15, -inf }
0x1a3a   : > { %v2618_v19 = vpop.eup %2617 }
0x1a3b   : > { %1658 = vrot.lane.b32.xlu1 %v2618_v19, %s2684_s27  ;;  %v2538_v19 = vld [vmem:[%s3339_s7 + $0x20] sm:$0xff]  }
0x1a3f   : > { %1767 = vrot.lane.b32.xlu1 %v1585_v54, %s2684_s27 }
0x1aad   : > { %v1659_v20 = vpop.permute.xlu1 %1658 }
0x1aae   : > { %v1661_v22 = vmul.f32 %v2616_v13, %v1659_v20 }
0x1ab0   : > { %1764 = vrot.lane.b32.xlu0 %v1661_v22, %s2685_s28  ;;  %v1662_v50 = vpack.c.bf16 %v1661_v22, %v1661_v22 }
0x1ab1   : > { %v1768_v27 = vpop.permute.xlu1 %1767 }
0x1b22   : > { %v1765_v29 = vpop.permute.xlu0 %1764 }
0x1b23   : > { %v1770_v49 = vsel %vm393_vm1, %v1765_v29, %v1768_v27 }
0x1b24   : > { %v1771_v30 = vpack.c.bf16 %v1770_v49, %v1770_v49 }
0x1b26   : > { %2472 = vmatmul.mubr.msk.bf16.vlgmr.msra.gmra.mxu1 %vm435_vm2, %v1771_v30 }
0x1b27   : > { %2491 = vmatprep.mubr.msk.bf16.mxu1 %vm2683_vm0, %v2682_v1 }
0x1be6   : > { %v1809_v11 = vpop.f32.mrf.mxu1 }
0x1be7   : > { %v1810_v10 = vadd.f32 %v2798_v8, %v1809_v11  ;;  %v2536_v8 = vld [vmem:[%s3337_s5 + $0x20] sm:$0xff]  }
0x1be8   : > { %v2473_v31 = vpop.f32.mrf.mxu1  ;;  %2458 = vmatpush3.bf16.msra.mxu0 %v2536_v8  ;;  %v2193_v8 = vld [vmem:[%s3340_s8 + $0x1] ss:$0 sm:$0xff] }
0x1be9   : > { %2619 = vtanh.f32 %v1810_v10  ;;  %v2211_v40 = vmul.f32 -1.442695, %v1810_v10  ;;  %2475 = vmatprep.subr.bf16.mxu0 %v2682_v1 }
0x1bea   : > { %v1812_v33 = vpop.f32.mrf.mxu1 }
0x1beb   : > { %2621 = vpow2.f32 %v2211_v40 }
0x1bec   : > { %v2474_v23 = vpop.f32.mrf.mxu1 }
0x1bf6   : > { %v2620_v38 = vpop.eup %2619 }
0x1bf7   : > { %1824 = vrot.lane.b32.xlu0 %v2620_v38, %s2684_s27 }
0x1bf8   : > { %v2622_v41 = vpop.eup %2621 }
0x1bf9   : > { %v1818_v43 = vadd.f32 1.0, %v2622_v41 }
0x1bfb   : > { %2623 = vrcp.f32 %v1818_v43 }
0x1c08   : > { %v2624_v45 = vpop.eup %2623 }
0x1c09   : > { %v1822_v53 = vmul.f32 %v2624_v45, %v3127_v51 }
0x1c69   : > { %v1825_v47 = vpop.permute.xlu0 %1824 }
0x1c6a   : > { %v1827_v48 = vmul.f32 %v2624_v45, %v1825_v47 }
0x1c6c   : > { %1829 = vrot.lane.b32.xlu1 %v1827_v48, %s2685_s28 }
0x1c70   : > { %1677 = vrot.lane.b32.xlu1 %v1662_v50, %s2685_s28 }
0x1c74   : > { %1843 = vrot.lane.b32.xlu1 %v1661_v22, %s2684_s27 }
0x1cde   : > { %v1830_v32 = vpop.permute.xlu1 %1829 }
0x1cdf   : > { %v1832_v39 = vadd.f32 %v1830_v32, %v1822_v53 }
0x1ce1   : > { %2625 = vtanh.f32 %v1832_v39  ;;  %v391_v39 = vlaneseq }
0x1ce2   : > { %v1678_v54 = vpop.permute.xlu1 %1677 }
0x1ce3   : > { %2460 = vmatmul.mubr.msk.bf16.vlgmr.msra.gmra.mxu0 %vm393_vm1, %v1678_v54 }
0x1ce4   : > { %2476 = vmatpush3.bf16.msra.mxu0 %v2809_v24  ;;  %2483 = vmatprep.mubr.msk.bf16.mxu0 %vm2683_vm0, %v2682_v1 }
0x1ce5   : > { %2477 = vmatprep.subr.bf16.mxu0 %v2682_v1 }
0x1ce6   : > { %v1844_v2 = vpop.permute.xlu1 %1843 }
0x1ce8   : > { %2478 = vmatpush3.bf16.msra.mxu0 %v2815_v25 }
0x1ce9   : > { %2479 = vmatprep.subr.bf16.mxu0 %v2682_v1 }
0x1cec   : > { %2480 = vmatpush3.bf16.msra.mxu0 %v2822_v26 }
0x1ced   : > { %2481 = vmatprep.subr.bf16.mxu0 %v2682_v1 }
0x1cee   : > { %v2626_v51 = vpop.eup %2625 }
0x1cef   : > { %1835 = vrot.lane.b32.xlu0 %v2626_v51, %s2684_s27  ;;  %v3241_v51 = vand.u32 127, %v391_v39 }
0x1cf0   : > { %2482 = vmatpush3.bf16.msra.mxu0 %v2831_v28 }
0x1d61   : > { %v1836_v0 = vpop.permute.xlu0 %1835 }
0x1d62   : > { %v1838_v24 = vmul.f32 %v2624_v45, %v1836_v0  ;;  %v3235_v45 = vadd.f32 %v2193_v8, %v3143_v57  ;;  %v2166_v0 = vld [vmem:[%s3340_s8] ss:$0 sm:$0xff] }
0x1d64   : > { %1840 = vrot.lane.b32.xlu0 %v1838_v24, %s2685_s28  ;;  %v1462_v47 = vsel %vm941_vm7, %v3235_v45, -inf }
0x1da3   : > { %v3204_v59 = vpop.f32.mrf.mxu0 }
0x1da5   : > { %v2461_v60 = vpop.f32.mrf.mxu0 }
0x1da6   : > { %v935_v60 = vadd.f32 %v2166_v0, %v3002_v37 }
0x1da7   : > { %v1731_v61 = vpop.f32.mrf.mxu0 }
0x1da9   : > { %v2462_v25 = vpop.f32.mrf.mxu0 }
0x1daa   : > { %v942_v25 = vsel %vm941_vm7, %v935_v60, -inf }
0x1dd6   : > { %v1841_v62 = vpop.permute.xlu0 %1840 }
0x1dd7   : > { %v1846_v26 = vsel %vm393_vm1, %v1841_v62, %v1844_v2 }
0x1dd8   : > { %v1847_v63 = vpack.c.bf16 %v1846_v26, %v1846_v26 }
0x1dda   : > { %2484 = vmatmul.mubr.msk.bf16.vlgmr.msra.gmra.mxu0 %vm435_vm2, %v1847_v63 }
0x1e9a   : > { %v1885_v3 = vpop.f32.mrf.mxu0 }
0x1e9b   : > { %v1886_v5 = vadd.f32 %v2854_v34, %v1885_v3 }
0x1e9c   : > { %v2485_v28 = vpop.f32.mrf.mxu0 }
0x1e9d   : > { %2627 = vtanh.f32 %v1886_v5  ;;  %v2213_v44 = vmul.f32 -1.442695, %v1886_v5 }
0x1e9e   : > { %v1888_v7 = vpop.f32.mrf.mxu0 }
0x1e9f   : > { %2629 = vpow2.f32 %v2213_v44 }
0x1ea0   : > { %v2486_v9 = vpop.f32.mrf.mxu0 }
0x1eaa   : > { %v2628_v56 = vpop.eup %2627 }
0x1eab   : > { %1900 = vrot.lane.b32.xlu0 %v2628_v56, %s2684_s27 }
0x1eac   : > { %v2630_v36 = vpop.eup %2629 }
0x1ead   : > { %v1894_v55 = vadd.f32 1.0, %v2630_v36 }
0x1eaf   : > { %2631 = vrcp.f32 %v1894_v55 }
0x1ebc   : > { %v2632_v52 = vpop.eup %2631 }
0x1ebd   : > { %v1898_v13 = vmul.f32 %v2632_v52, %v3168_v18  ;;  %v2537_v18 = vld [vmem:[%s3339_s7 + $0x28] sm:$0xff]  }
0x1ebe   : > { %2488 = vmatpush3.bf16.msra.mxu1 %v2537_v18 }
0x1ebf   : > { %2489 = vmatprep.subr.bf16.mxu1 %v2682_v1 }
0x1ec2   : > { %2490 = vmatpush3.bf16.msra.mxu1 %v2538_v19 }
0x1f1d   : > { %v1901_v12 = vpop.permute.xlu0 %1900 }
0x1f1e   : > { %v1903_v4 = vmul.f32 %v2632_v52, %v1901_v12  ;;  %v3265_v12 = vsel %vm969_vm3, 1.0, %v2682_v1 }
0x1f20   : > { %1905 = vrot.lane.b32.xlu1 %v1903_v4, %s2685_s28 }
0x1f92   : > { %v1906_v34 = vpop.permute.xlu1 %1905 }
0x1f93   : > { %v1908_v14 = vadd.f32 %v1906_v34, %v1898_v13 }
0x1f95   : > { %2633 = vtanh.f32 %v1908_v14 }
0x1fa2   : > { %v2634_v6 = vpop.eup %2633 }
0x1fa3   : > { %1911 = vrot.lane.b32.xlu0 %v2634_v6, %s2684_s27  ;;  %v2180_v6 = vld [vmem:[%s3338_s6 + $0x1] ss:$0 sm:$0xff] }
0x1fc2   : > { %690 = vmax.xlane.f32.xlu0 %v689_v17  ;;  %v1204_v17 = vadd.f32 %v2180_v6, %v3070_v46 }
0x2015   : > { %v1912_v20 = vpop.permute.xlu0 %1911 }
0x2016   : > { %v1914_v22 = vmul.f32 %v2632_v52, %v1912_v20  ;;  %v3258_v52 = vld [vmem:[%s374_s14] sm:$0xff] }
0x2018   : > { %v1915_v27 = vpack.c.bf16 %v1914_v22, %v1914_v22 }
0x201a   : > { %1930 = vrot.lane.b32.xlu1 %v1915_v27, %s2685_s28 }
0x204b   : > { %v691_v21 = vpop.xlane.xlu0 %690 }
0x204c   : > { %v692_v29 = vsub.f32 %v682_v15, %v691_v21 }
0x204e   : > { %v693_v49 = vmul.f32 1.442695, %v692_v29 }
0x2050   : > { %2635 = vpow2.f32 %v693_v49 }
0x205d   : > { %v2636_v30 = vpop.eup %2635 }
0x205e   : > { %v695_v11 = vsel %vm688_vm6, %v2636_v30, 0.0 }
0x205f   : > { %696 = vadd.xlane.f32.xlu1 %v695_v11 }
0x208c   : > { %v1931_v10 = vpop.permute.xlu1 %1930 }
0x208d   : > { %2492 = vmatmul.mubr.msk.bf16.vlgmr.msra.gmra.mxu1 %vm393_vm1, %v1931_v10 }
0x20e8   : > { %v697_v31 = vpop.xlane.xlu1 %696 }
0x20e9   : > { %2637 = vlog2.f32 %v697_v31 }
0x20ea   : > { %2639 = vrcp.f32 %v697_v31 }
0x20f6   : > { %v2638_v33 = vpop.eup %2637 }
0x20f7   : > { %v2640_v23 = vpop.eup %2639  ;;  %v699_v16 = vmul.f32 0.6931472, %v2638_v33 }
0x20f8   : > { %v702_v40 = vmul.f32 %v2640_v23, %v2636_v30 }
0x20f9   : > { %v700_v38 = vsub.f32 %v692_v29, %v699_v16  ;;  %v3277_v29 = vld [vmem:[%s2932_s30] sm:$0xff] }
0x20fb   : > { %v703_v41 = vmul.f32 %v702_v40, %v700_v38 }
0x20fd   : > { %v704_v43 = vsel %vm688_vm6, %v703_v41, 0.0 }
0x20fe   : > { %705 = vadd.xlane.f32.xlu0 %v704_v43  ;;  %v2219_v43 = vld [vmem:[%s3340_s8 + $0x2] ss:$0 sm:$0xff] }
0x2114   : > { %709 = vperm.xlu0 %2514, %v2935_v42   ;;  %v1209_v42 = vsel %vm688_vm6, %v1204_v17, -inf }
0x2118   : > { %2515 = vset.pattern.permute.xlu0 %v2687_v58 }
0x2133   : > { %1463 = vmax.xlane.f32.xlu0 %v1462_v47 }
0x214d   : > { %v3239_v48 = vpop.f32.mrf.mxu1 }
0x214f   : > { %v2493_v50 = vpop.f32.mrf.mxu1 }
0x2151   : > { %v1984_v53 = vpop.f32.mrf.mxu1 }
0x2153   : > { %v2494_v32 = vpop.f32.mrf.mxu1 }
0x2187   : > { %v706_v54 = vpop.xlane.xlu0 %705 }
0x2188   : > { %v707_v34 = vsub.f32 0.0, %v706_v54 }
0x218f   : > { %v710_v57 = vpop.permute.xlu0 %709 }
0x2190   : > { %vm711_vm8 = vcmp.eq.s32.totalorder %v3241_v51, %v710_v57 }
0x2191   : > { %v712_v24 = vsel %vm711_vm8, %v700_v38, 0.0 }
0x2192   : > { %v713_v61 = vsel %vm688_vm6, %v712_v24, 0.0 }
0x2193   : > { %714 = vadd.xlane.f32.xlu1 %v713_v61 }
0x2197   : > { %943 = vmax.xlane.f32.xlu1 %v942_v25 }
0x21bc   : > { %v1464_v46 = vpop.xlane.xlu0 %1463 }
0x21bd   : > { %v1465_v30 = vsub.f32 %v3235_v45, %v1464_v46  ;;  %v1982_v45 = vadd.f32 %v2219_v43, %v3239_v48 }
0x21bf   : > { %v1466_v11 = vmul.f32 1.442695, %v1465_v30  ;;  %v1987_v50 = vsel %vm941_vm7, %v1982_v45, -inf }
0x221c   : > { %v3250_v2 = vpop.xlane.xlu1 %714 }
0x2220   : > { %v944_v62 = vpop.xlane.xlu1 %943 }
0x2221   : > { %v945_v26 = vsub.f32 %v935_v60, %v944_v62 }
0x2223   : > { %v946_v63 = vmul.f32 1.442695, %v945_v26 }
0x2225   : > { %2641 = vpow2.f32 %v946_v63 }
0x2232   : > { %v2642_v3 = vpop.eup %2641 }
0x2233   : > { %v948_v5 = vsel %vm941_vm7, %v2642_v3, 0.0 }
0x2234   : > { %949 = vadd.xlane.f32.xlu1 %v948_v5 }
0x22bd   : > { %v950_v28 = vpop.xlane.xlu1 %949 }
0x22be   : > { %2643 = vlog2.f32 %v950_v28 }
0x22bf   : > { %2645 = vrcp.f32 %v950_v28 }
0x22cb   : > { %v2644_v37 = vpop.eup %2643 }
0x22cc   : > { %v2646_v7 = vpop.eup %2645  ;;  %v952_v9 = vmul.f32 0.6931472, %v2644_v37 }
0x22cd   : > { %v955_v44 = vmul.f32 %v2646_v7, %v2642_v3 }
0x22ce   : > { %v953_v56 = vsub.f32 %v945_v26, %v952_v9  ;;  %v2206_v9 = vld [vmem:[%s3338_s6 + $0x2] ss:$0 sm:$0xff] }
0x22d0   : > { %v956_v36 = vmul.f32 %v955_v44, %v953_v56 }
0x22d2   : > { %v957_v55 = vsel %vm941_vm7, %v956_v36, 0.0 }
0x22d3   : > { %958 = vadd.xlane.f32.xlu1 %v957_v55 }
0x22e4   : > { %962 = vperm.xlu1 %2512, %v3258_v52  }
0x22e8   : > { %2516 = vset.pattern.permute.xlu1 %v2687_v58 }
0x235c   : > { %v959_v4 = vpop.xlane.xlu1 %958 }
0x235d   : > { %v960_v13 = vsub.f32 0.0, %v959_v4  ;;  %v2688_v4 = vmov 2  }
0x235f   : > { %v972_v14 = vmul.f32 %v3265_v12, %v960_v13 }
0x2360   : > { %v963_v35 = vpop.permute.xlu1 %962 }
0x2361   : > { %vm964_vm9 = vcmp.eq.s32.totalorder %v3241_v51, %v963_v35  ;;  %v973_v15 = vadd.f32 %v972_v14, %v707_v34 }
0x2362   : > { %v965_v58 = vsel %vm964_vm9, %v953_v56, 0.0  ;;  %v1729_v56 = vadd.f32 %v2206_v9, %v3204_v59 }
0x2363   : > { %v966_v1 = vsel %vm941_vm7, %v965_v58, 0.0 }
0x2364   : > { %967 = vadd.xlane.f32.xlu1 %v966_v1  ;;  %v1734_v44 = vsel %vm688_vm6, %v1729_v56, -inf }
0x2368   : > { %1210 = vmax.xlane.f32.xlu1 %v1209_v42 }
0x23ed   : > { %v968_v18 = vpop.xlane.xlu1 %967 }
0x23ee   : > { %v974_v39 = vmul.f32 %v3265_v12, %v968_v18 }
0x23f0   : > { %v975_v57 = vadd.f32 %v974_v39, %v3250_v2 }
0x23f1   : > { %v1211_v19 = vpop.xlane.xlu1 %1210 }
0x23f2   : > { %v1212_v20 = vsub.f32 %v1204_v17, %v1211_v19 }
0x23f4   : > { %v1213_v22 = vmul.f32 1.442695, %v1212_v20 }
0x23f6   : > { %2647 = vpow2.f32 %v1213_v22 }
0x2403   : > { %v2648_v27 = vpop.eup %2647 }
0x2404   : > { %v1215_v21 = vsel %vm688_vm6, %v2648_v27, 0.0 }
0x2405   : > { %1216 = vadd.xlane.f32.xlu0 %v1215_v21 }
0x241b   : > { %1229 = vperm.xlu0 %2515, %v3277_v29  }
0x241f   : > { %2517 = vset.pattern.permute.xlu0 %v2688_v4 }
0x248e   : > { %v1217_v49 = vpop.xlane.xlu0 %1216 }
0x248f   : > { %2649 = vlog2.f32 %v1217_v49 }
0x2490   : > { %2651 = vrcp.f32 %v1217_v49 }
0x2491   : > { %2653 = vpow2.f32 %v1466_v11 }
0x2496   : > { %v1230_v23 = vpop.permute.xlu0 %1229 }
0x2497   : > { %vm1231_vm10 = vcmp.eq.s32.totalorder %v3241_v51, %v1230_v23 }
0x249c   : > { %v2650_v10 = vpop.eup %2649 }
0x249d   : > { %v2652_v31 = vpop.eup %2651  ;;  %v1219_v33 = vmul.f32 0.6931472, %v2650_v10 }
0x249e   : > { %v1222_v38 = vmul.f32 %v2652_v31, %v2648_v27  ;;  %v2654_v53 = vpop.eup %2653 }
0x249f   : > { %v1220_v16 = vsub.f32 %v1212_v20, %v1219_v33  ;;  %v1468_v32 = vsel %vm941_vm7, %v2654_v53, 0.0 }
0x24a1   : > { %v1223_v40 = vmul.f32 %v1222_v38, %v1220_v16  ;;  %v1232_v8 = vsel %vm1231_vm10, %v1220_v16, 0.0 }
0x24a2   : > { %v1233_v47 = vsel %vm688_vm6, %v1232_v8, 0.0 }
0x24a3   : > { %v1224_v41 = vsel %vm688_vm6, %v1223_v40, 0.0 }
0x24a4   : > { %1225 = vadd.xlane.f32.xlu1 %v1224_v41 }
0x24a8   : > { %1234 = vadd.xlane.f32.xlu1 %v1233_v47 }
0x24ac   : > { %1988 = vmax.xlane.f32.xlu1 %v1987_v50 }
0x24b0   : > { %1469 = vadd.xlane.f32.xlu1 %v1468_v32 }
0x252d   : > { %v1226_v54 = vpop.xlane.xlu1 %1225 }
0x252e   : > { %v1227_v0 = vsub.f32 0.0, %v1226_v54 }
0x2530   : > { %v3292_v24 = vadd.f32 %v1227_v0, %v973_v15 }
0x2531   : > { %v1235_v60 = vpop.xlane.xlu1 %1234 }
0x2532   : > { %v3294_v48 = vadd.f32 %v1235_v60, %v975_v57 }
0x2535   : > { %v1989_v61 = vpop.xlane.xlu1 %1988 }
0x2536   : > { %v1990_v2 = vsub.f32 %v1982_v45, %v1989_v61 }
0x2538   : > { %v1991_v7 = vmul.f32 1.442695, %v1990_v2 }
0x2539   : > { %v1470_v25 = vpop.xlane.xlu1 %1469 }
0x253a   : > { %2655 = vlog2.f32 %v1470_v25 }
0x253b   : > { %2657 = vrcp.f32 %v1470_v25 }
0x253c   : > { %2659 = vpow2.f32 %v1991_v7 }
0x2547   : > { %v2656_v62 = vpop.eup %2655 }
0x2548   : > { %v2658_v26 = vpop.eup %2657  ;;  %v1472_v63 = vmul.f32 0.6931472, %v2656_v62 }
0x2549   : > { %v1475_v5 = vmul.f32 %v2658_v26, %v2654_v53  ;;  %v2660_v36 = vpop.eup %2659 }
0x254a   : > { %v1473_v3 = vsub.f32 %v1465_v30, %v1472_v63  ;;  %v1993_v55 = vsel %vm941_vm7, %v2660_v36, 0.0 }
0x254c   : > { %v1476_v28 = vmul.f32 %v1475_v5, %v1473_v3 }
0x254e   : > { %v1477_v37 = vsel %vm941_vm7, %v1476_v28, 0.0 }
0x254f   : > { %1478 = vadd.xlane.f32.xlu1 %v1477_v37 }
0x2560   : > { %1482 = vperm.xlu1 %2516, %v3258_v52  }
0x2564   : > { %2518 = vset.pattern.permute.xlu1 %v2688_v4 }
0x2584   : > { %1735 = vmax.xlane.f32.xlu1 %v1734_v44 }
0x2588   : > { %1994 = vadd.xlane.f32.xlu1 %v1993_v55 }
0x25d8   : > { %v1479_v13 = vpop.xlane.xlu1 %1478 }
0x25d9   : > { %v1480_v34 = vsub.f32 0.0, %v1479_v13 }
0x25db   : > { %v1489_v14 = vmul.f32 %v3265_v12, %v1480_v34 }
0x25dc   : > { %v1483_v6 = vpop.permute.xlu1 %1482 }
0x25dd   : > { %vm1484_vm11 = vcmp.eq.s32.totalorder %v3241_v51, %v1483_v6  ;;  %1491 = vrot.lane.b32.xlu1 %v1489_v14, %s2689_s18 }
0x25de   : > { %v1485_v59 = vsel %vm1484_vm11, %v1473_v3, 0.0 }
0x25df   : > { %v1486_v35 = vsel %vm941_vm7, %v1485_v59, 0.0 }
0x25e0   : > { %1487 = vadd.xlane.f32.xlu0 %v1486_v35 }
0x260d   : > { %v1736_v15 = vpop.xlane.xlu1 %1735 }
0x260e   : > { %v1737_v58 = vsub.f32 %v1729_v56, %v1736_v15 }
0x2610   : > { %v1738_v17 = vmul.f32 1.442695, %v1737_v58 }
0x2611   : > { %v1995_v20 = vpop.xlane.xlu1 %1994 }
0x2612   : > { %2661 = vpow2.f32 %v1738_v17 }
0x2613   : > { %2663 = vlog2.f32 %v1995_v20 }
0x261f   : > { %v2662_v1 = vpop.eup %2661 }
0x2620   : > { %v1740_v42 = vsel %vm688_vm6, %v2662_v1, 0.0  ;;  %v2664_v21 = vpop.eup %2663 }
0x2621   : > { %1741 = vadd.xlane.f32.xlu1 %v1740_v42  ;;  %v1997_v46 = vmul.f32 0.6931472, %v2664_v21 }
0x2623   : > { %v1998_v23 = vsub.f32 %v1990_v2, %v1997_v46 }
0x2632   : > { %1754 = vperm.xlu1 %2518, %v3277_v29  }
0x264f   : > { %v1492_v22 = vpop.permute.xlu1 %1491 }
0x2650   : > { %v1494_v54 = vadd.f32 %v1492_v22, %v3292_v24 }
0x2669   : > { %v1488_v18 = vpop.xlane.xlu0 %1487 }
0x266a   : > { %v1495_v19 = vmul.f32 %v3265_v12, %v1488_v18 }
0x266c   : > { %1497 = vrot.lane.b32.xlu0 %v1495_v19, %s2689_s18 }
0x2670   : > { %2007 = vperm.xlu0 %2517, %v3258_v52  }
0x26aa   : > { %v1742_v27 = vpop.xlane.xlu1 %1741 }
0x26ab   : > { %2665 = vlog2.f32 %v1742_v27 }
0x26ac   : > { %2667 = vrcp.f32 %v1742_v27 }
0x26ad   : > { %2669 = vrcp.f32 %v1995_v20 }
0x26ae   : > { %v1755_v49 = vpop.permute.xlu1 %1754 }
0x26af   : > { %vm1756_vm12 = vcmp.eq.s32.totalorder %v3241_v51, %v1755_v49 }
0x26b8   : > { %v2666_v30 = vpop.eup %2665 }
0x26b9   : > { %v2668_v11 = vpop.eup %2667  ;;  %v1744_v10 = vmul.f32 0.6931472, %v2666_v30 }
0x26ba   : > { %v2670_v29 = vpop.eup %2669  ;;  %v1747_v33 = vmul.f32 %v2668_v11, %v2662_v1 }
0x26bb   : > { %v1745_v31 = vsub.f32 %v1737_v58, %v1744_v10  ;;  %v2000_v38 = vmul.f32 %v2670_v29, %v2660_v36 }
0x26bd   : > { %v1757_v52 = vsel %vm1756_vm12, %v1745_v31, 0.0  ;;  %v1748_v16 = vmul.f32 %v1747_v33, %v1745_v31  ;;  %v2001_v43 = vmul.f32 %v2000_v38, %v1998_v23 }
0x26be   : > { %v1758_v40 = vsel %vm688_vm6, %v1757_v52, 0.0 }
0x26bf   : > { %1759 = vadd.xlane.f32.xlu1 %v1758_v40  ;;  %v1749_v41 = vsel %vm688_vm6, %v1748_v16, 0.0  ;;  %v2002_v8 = vsel %vm941_vm7, %v2001_v43, 0.0 }
0x26c0   : > { %1750 = vadd.xlane.f32.xlu0 %v1749_v41 }
0x26c4   : > { %2003 = vadd.xlane.f32.xlu0 %v2002_v8 }
0x26de   : > { %v1498_v45 = vpop.permute.xlu0 %1497 }
0x26df   : > { %v1500_v47 = vadd.f32 %v1498_v45, %v3294_v48 }
0x26eb   : > { %v2008_v50 = vpop.permute.xlu0 %2007 }
0x26ec   : > { %vm2009_vm13 = vcmp.eq.s32.totalorder %v3241_v51, %v2008_v50 }
0x26ed   : > { %v2010_v53 = vsel %vm2009_vm13, %v1998_v23, 0.0 }
0x26ee   : > { %v2011_v32 = vsel %vm941_vm7, %v2010_v53, 0.0 }
0x26ef   : > { %2012 = vadd.xlane.f32.xlu0 %v2011_v32 }
0x2748   : > { %v1760_v26 = vpop.xlane.xlu1 %1759 }
0x2749   : > { %v1751_v39 = vpop.xlane.xlu0 %1750  ;;  %v1762_v63 = vadd.f32 %v1760_v26, %v1500_v47 }
0x274a   : > { %v1752_v0 = vsub.f32 0.0, %v1751_v39 }
0x274c   : > { %v1761_v57 = vadd.f32 %v1752_v0, %v1494_v54 }
0x274d   : > { %v2004_v60 = vpop.xlane.xlu0 %2003 }
0x274e   : > { %v2005_v61 = vsub.f32 0.0, %v2004_v60 }
0x2750   : > { %v2014_v25 = vmul.f32 %v3265_v12, %v2005_v61 }
0x2752   : > { %2016 = vrot.lane.b32.xlu0 %v2014_v25, %s2690_s19 }
0x2778   : > { %v2013_v48 = vpop.xlane.xlu0 %2012 }
0x2779   : > { %v2020_v51 = vmul.f32 %v3265_v12, %v2013_v48 }
0x277b   : > { %2022 = vrot.lane.b32.xlu0 %v2020_v51, %s2690_s19 }
0x27c4   : > { %v2017_v62 = vpop.permute.xlu0 %2016 }
0x27c5   : > { %v2019_v24 = vadd.f32 %v2017_v62, %v1761_v57 }
0x27c7   : > { %2027 = vst.msk [vmem:[%s378_s22] sm:$0xff] %vm2026_vm14, %v2019_v24 }
0x27ed   : > { %v2023_v3 = vpop.permute.xlu0 %2022 }
0x27ee   : > { %v2025_v5 = vadd.f32 %v2023_v3, %v1762_v63 }
0x27f0   : > { %2028 = vst.msk [vmem:[%s382_s23] sm:$0xff] %vm2026_vm14, %v2025_v5 }
0x27f1 PF: > { %s21_s13 = sadd.s32 1, %s2680_s13  }
0x27f2   : > { %p18_p4 = scmp.ge.s32.totalorder %s21_s13, 4  }
0x27f4   :  { %20 = sbr.rel (!%p18_p4) target bundleno = 1 (0x1), region = 111 }

</bundles_post_ra>
